<compile_context>
chip_gen: v7x
topology: tpu7x:2x2x1
jax: 0.10.0
libtpu: 0.0.40
codegen_flags: <defaults>
</compile_context>

<pallas_src>
import numpy as np
import jax
import jax.numpy as jnp
from jax.experimental import pallas as pl
from jax.experimental.pallas import tpu as pltpu


def get_sinusoid_encoding_table(n_position, d_hid):
    pos = np.arange(n_position)[:, None].astype(np.float64)
    hid = np.arange(d_hid)[None, :]
    angle = pos / np.power(10000.0, 2.0 * (hid // 2) / d_hid)
    table = angle.copy()
    table[:, 0::2] = np.sin(angle[:, 0::2])
    table[:, 1::2] = np.cos(angle[:, 1::2])
    return jnp.asarray(table.astype(np.float32))


def _choose_b_blk(B, T):
    # aim for >=256 rows per grid step so projections / conv taps are MXU-wide
    target = max(1, -(-256 // T))
    if target >= B:
        return B
    return max(8, (target // 8) * 8)   # multiple of 8 keeps BlockSpecs tile-legal


def make_decoder_stack_kernel(Bb, T, D, n_head, d_k, d_inner, k1, k2):
    R = Bb * T
    inv_sqrt_dk = 1.0 / float(np.sqrt(d_k))
    p1, p2 = (k1 - 1) // 2, (k2 - 1) // 2
    eps = 1e-5

    def layer_norm(v, g, b):
        mu = jnp.mean(v, axis=-1, keepdims=True)
        c = v - mu
        var = jnp.mean(c * c, axis=-1, keepdims=True)
        return c * jax.lax.rsqrt(var + eps) * g + b

    def kernel(x_ref, pe_ref, maskc_ref, maskr_ref,
               wq_ref, bq_ref, wk_ref, bk_ref, wv_ref, bv_ref,
               wo_ref, bo_ref, ln1g_ref, ln1b_ref,
               c1w_ref, c1b_ref, c2w_ref, c2b_ref,
               ln2g_ref, ln2b_ref,
               o_ref, *pad_bufs):
        l = pl.program_id(1)

        idx = 0
        pad1 = pad2 = None
        if k1 > 1:
            pad1 = pad_bufs[idx]; idx += 1
        if k2 > 1:
            pad2 = pad_bufs[idx]; idx += 1

        # Layer 0: fuse the positional-encoding add and write the zero halo
        # borders of the conv scratch buffers exactly once per batch tile.
        # The activation then stays resident in the revisited output block for
        # the whole layer stack.
        @pl.when(l == 0)
        def _():
            o_ref[...] = x_ref[...] + pe_ref[...][None, :, :]
            if k1 > 1:
                pad1[:, 0:p1, :] = jnp.zeros((Bb, p1, D), jnp.float32)
                pad1[:, p1 + T:, :] = jnp.zeros((Bb, p1, D), jnp.float32)
            if k2 > 1:
                pad2[:, 0:p2, :] = jnp.zeros((Bb, p2, d_inner), jnp.float32)
                pad2[:, p2 + T:, :] = jnp.zeros((Bb, p2, d_inner), jnp.float32)

        x3 = o_ref[...]                            # (Bb, T, D)  f32
        x2 = x3.reshape(R, D)
        xb = x2.astype(jnp.bfloat16)

        keep = (1.0 - maskc_ref[...]).reshape(R, 1)     # (R, 1)  1 on real tokens
        neg_bias = maskr_ref[...] * (-1e9)              # (Bb, 1, T)  additive key mask

        # ---------------- multi-head self-attention ----------------
        q = jnp.dot(xb, wq_ref[...], preferred_element_type=jnp.float32) + bq_ref[...]
        q = q * inv_sqrt_dk                        # fold 1/sqrt(d_k) into Q once
        k = jnp.dot(xb, wk_ref[...], preferred_element_type=jnp.float32) + bk_ref[...]
        v = jnp.dot(xb, wv_ref[...], preferred_element_type=jnp.float32) + bv_ref[...]

        attn_out = None
        for h in range(n_head):                    # static unroll over heads
            sl = slice(h * d_k, (h + 1) * d_k)
            qh = q[:, sl].reshape(Bb, T, d_k).astype(jnp.bfloat16)
            kh = k[:, sl].reshape(Bb, T, d_k).astype(jnp.bfloat16)
            vh = v[:, sl].reshape(Bb, T, d_k).astype(jnp.bfloat16)
            s = jnp.einsum('bqd,bkd->bqk', qh, kh,
                           preferred_element_type=jnp.float32)
            s = s + neg_bias                       # masked_fill(mask, -inf)
            s = s - jnp.max(s, axis=-1, keepdims=True)
            e = jnp.exp(s)
            p = e * pl.reciprocal(jnp.sum(e, axis=-1, keepdims=True), approx=True)
            ctx = jnp.einsum('bqk,bkd->bqd', p.astype(jnp.bfloat16), vh,
                             preferred_element_type=jnp.float32)
            # fold concat + output projection into per-head partial matmuls
            contrib = jnp.dot(ctx.reshape(R, d_k).astype(jnp.bfloat16),
                              wo_ref[sl, :], preferred_element_type=jnp.float32)
            attn_out = contrib if attn_out is None else attn_out + contrib

        out = attn_out + bo_ref[...] + x2
        out = layer_norm(out, ln1g_ref[...], ln1b_ref[...]) * keep

        # ------------- position-wise Conv1d feed-forward ------------
        resid = out

        def conv1d_same(val2, cin, w_ref, b_row, kk, pad_buf):
            if kk == 1:
                return jnp.dot(val2.astype(jnp.bfloat16), w_ref[0],
                               preferred_element_type=jnp.float32) + b_row
            pp = (kk - 1) // 2
            # middle band of the zero-bordered scratch; borders were written at l==0
            pad_buf[:, pp:pp + T, :] = val2.reshape(Bb, T, cin)
            acc = jnp.dot(pad_buf[:, 0:T, :].reshape(R, cin).astype(jnp.bfloat16),
                          w_ref[0], preferred_element_type=jnp.float32) + b_row
            for j in range(1, kk):
                acc = acc + jnp.dot(
                    pad_buf[:, j:j + T, :].reshape(R, cin).astype(jnp.bfloat16),
                    w_ref[j], preferred_element_type=jnp.float32)
            return acc

        h1 = jnp.maximum(
            conv1d_same(out, D, c1w_ref, c1b_ref[...], k1, pad1), 0.0)
        out2 = conv1d_same(h1, d_inner, c2w_ref, c2b_ref[...], k2, pad2) + resid
        out2 = layer_norm(out2, ln2g_ref[...], ln2b_ref[...]) * keep

        o_ref[...] = out2.reshape(Bb, T, D)

    return kernel


def fused_decoder_stack(x, mask_f, pe, lp, *, n_head, d_k, d_inner, k1, k2, b_blk=None):
    B, T, D = x.shape
    L = lp['wq'].shape[0]
    assert D == n_head * d_k
    assert k1 % 2 == 1 and k2 % 2 == 1, \
        "even conv kernel sizes are not shape-consistent with PyTorch 'same' padding"

    if b_blk is None:
        b_blk = _choose_b_blk(B, T)
    n_bt = -(-B // b_blk)
    B_pad = n_bt * b_blk
    if B_pad != B:
        x = jnp.pad(x, ((0, B_pad - B), (0, 0), (0, 0)))
        mask_f = jnp.pad(mask_f, ((0, B_pad - B), (0, 0)), constant_values=1.0)

    mask_col = mask_f[:, :, None]    # (B, T, 1): zero padded query rows
    mask_row = mask_f[:, None, :]    # (B, 1, T): mask padded keys

    names = ['wq', 'bq', 'wk', 'bk', 'wv', 'bv', 'wo', 'bo',
             'ln1_g', 'ln1_b', 'c1_w', 'c1_b', 'c2_w', 'c2_b', 'ln2_g', 'ln2_b']
    weights = [lp[n] for n in names]

    def wspec(w):
        nd = w.ndim
        return pl.BlockSpec((None,) + tuple(w.shape[1:]),
                            lambda b, l, _n=nd: (l,) + (0,) * (_n - 1))

    in_specs = ([pl.BlockSpec((b_blk, T, D), lambda b, l: (b, 0, 0)),
                 pl.BlockSpec((T, D), lambda b, l: (0, 0)),
                 pl.BlockSpec((b_blk, T, 1), lambda b, l: (b, 0, 0)),
                 pl.BlockSpec((b_blk, 1, T), lambda b, l: (b, 0, 0))]
                + [wspec(w) for w in weights])

    p1, p2 = (k1 - 1) // 2, (k2 - 1) // 2
    scratch = []
    if k1 > 1:
        scratch.append(pltpu.VMEM((b_blk, T + 2 * p1, D), jnp.float32))
    if k2 > 1:
        scratch.append(pltpu.VMEM((b_blk, T + 2 * p2, d_inner), jnp.float32))

    kernel = make_decoder_stack_kernel(b_blk, T, D, n_head, d_k, d_inner, k1, k2)

    out = pl.pallas_call(
        kernel,
        out_shape=jax.ShapeDtypeStruct((B_pad, T, D), jnp.float32),
        grid=(n_bt, L),
        in_specs=in_specs,
        out_specs=pl.BlockSpec((b_blk, T, D), lambda b, l: (b, 0, 0)),
        scratch_shapes=scratch,
        compiler_params=pltpu.CompilerParams(
            dimension_semantics=("parallel", "arbitrary"),
            vmem_limit_bytes=48 * 1024 * 1024),
    )(x, pe, mask_col, mask_row, *weights)
    return out[:B]


def init_params(key, d_model, n_layers, n_head, d_inner, k1, k2, n_position):
    assert d_model % n_head == 0
    d_k = d_model // n_head
    H = n_head * d_k
    L = n_layers
    ks = jax.random.split(key, 6)

    def nrm(k, shape, scale=0.02):
        return scale * jax.random.normal(k, shape, jnp.float32)

    layers = {
        'wq': nrm(ks[0], (L, d_model, H)).astype(jnp.bfloat16),
        'bq': jnp.zeros((L, 1, H), jnp.float32),
        'wk': nrm(ks[1], (L, d_model, H)).astype(jnp.bfloat16),
        'bk': jnp.zeros((L, 1, H), jnp.float32),
        'wv': nrm(ks[2], (L, d_model, H)).astype(jnp.bfloat16),
        'bv': jnp.zeros((L, 1, H), jnp.float32),
        'wo': nrm(ks[3], (L, H, d_model)).astype(jnp.bfloat16),
        'bo': jnp.zeros((L, 1, d_model), jnp.float32),
        'ln1_g': jnp.ones((L, 1, d_model), jnp.float32),
        'ln1_b': jnp.zeros((L, 1, d_model), jnp.float32),
        # Conv1d weights stored as (layer, kernel_tap, c_in, c_out) for tap matmuls
        'c1_w': nrm(ks[4], (L, k1, d_model, d_inner)).astype(jnp.bfloat16),
        'c1_b': jnp.zeros((L, 1, d_inner), jnp.float32),
        'c2_w': nrm(ks[5], (L, k2, d_inner, d_model)).astype(jnp.bfloat16),
        'c2_b': jnp.zeros((L, 1, d_model), jnp.float32),
        'ln2_g': jnp.ones((L, 1, d_model), jnp.float32),
        'ln2_b': jnp.zeros((L, 1, d_model), jnp.float32),
    }
    return {'pos_enc': get_sinusoid_encoding_table(n_position, d_model),
            'layers': layers}


def decoder_forward(enc_seq, mask, params, *, n_head, d_inner, k1, k2,
                    max_seq_len, b_blk=None):
    """Mirror of Decoder.forward (inference): returns (dec_output, mask)."""
    B, T_in, D = enc_seq.shape
    d_k = D // n_head
    if T_in > max_seq_len:
        # long-sequence inference path: recompute the sinusoid table on the fly
        pe = get_sinusoid_encoding_table(T_in, D)
        x, m = enc_seq, mask
    else:
        T = min(T_in, max_seq_len)
        x = enc_seq[:, :T, :]
        m = mask[:, :T]
        pe = params['pos_enc'][:T]
    dec = fused_decoder_stack(x, m.astype(jnp.float32), pe, params['layers'],
                              n_head=n_head, d_k=d_k, d_inner=d_inner,
                              k1=k1, k2=k2, b_blk=b_blk)
    # TODO(synk): return_attns=True path (per-layer attention maps) is not wired out.
    return dec, m


if __name__ == "__main__":
    # small config consistent with the module's __init__
    max_seq_len = 16
    d_model = 32          # decoder_hidden
    n_layers = 2          # decoder_layer
    n_head = 2            # decoder_head
    d_inner = 64          # conv_filter_size
    k1, k2 = 3, 1         # conv_kernel_size
    B, T = 2, 8

    key = jax.random.PRNGKey(0)
    kp, kx = jax.random.split(key)
    params = init_params(kp, d_model, n_layers, n_head, d_inner, k1, k2,
                         n_position=max_seq_len + 1)

    enc_seq = 0.1 * jax.random.normal(kx, (B, T, d_model), jnp.float32)
    lengths = jnp.array([5, 7], jnp.int32)
    mask = jnp.arange(T)[None, :] >= lengths[:, None]     # (B, T) bool, True = PAD

    dec_out, out_mask = decoder_forward(enc_seq, mask, params,
                                        n_head=n_head, d_inner=d_inner,
                                        k1=k1, k2=k2, max_seq_len=max_seq_len)
    dec_out = jax.block_until_ready(dec_out)

    assert dec_out.shape == (B, T, d_model)
    assert out_mask.shape == (B, T)
    assert bool(jnp.all(jnp.isfinite(dec_out)))
    # masked_fill semantics: padded positions must be exactly zero
    assert bool(jnp.all(jnp.where(mask[:, :, None], dec_out == 0.0, True)))
    print("KERNEL_OK")
</pallas_src>

<mosaic_0001>
module attributes {stable_mosaic.version = 11 : i64} {
  func.func @kernel(%arg0: i32, %arg1: i32, %arg2: memref<2x8x32xf32, #tpu.memory_space<vmem>>, %arg3: memref<8x32xf32, #tpu.memory_space<vmem>>, %arg4: memref<2x8x1xf32, #tpu.memory_space<vmem>>, %arg5: memref<2x1x8xf32, #tpu.memory_space<vmem>>, %arg6: memref<1x32x32xbf16, #tpu.memory_space<vmem>>, %arg7: memref<1x1x32xf32, #tpu.memory_space<vmem>>, %arg8: memref<1x32x32xbf16, #tpu.memory_space<vmem>>, %arg9: memref<1x1x32xf32, #tpu.memory_space<vmem>>, %arg10: memref<1x32x32xbf16, #tpu.memory_space<vmem>>, %arg11: memref<1x1x32xf32, #tpu.memory_space<vmem>>, %arg12: memref<1x32x32xbf16, #tpu.memory_space<vmem>>, %arg13: memref<1x1x32xf32, #tpu.memory_space<vmem>>, %arg14: memref<1x1x32xf32, #tpu.memory_space<vmem>>, %arg15: memref<1x1x32xf32, #tpu.memory_space<vmem>>, %arg16: memref<1x3x32x64xbf16, #tpu.memory_space<vmem>>, %arg17: memref<1x1x64xf32, #tpu.memory_space<vmem>>, %arg18: memref<1x1x64x32xbf16, #tpu.memory_space<vmem>>, %arg19: memref<1x1x32xf32, #tpu.memory_space<vmem>>, %arg20: memref<1x1x32xf32, #tpu.memory_space<vmem>>, %arg21: memref<1x1x32xf32, #tpu.memory_space<vmem>>, %arg22: memref<2x8x32xf32, #tpu.memory_space<vmem>>, %arg23: memref<2x10x32xf32, #tpu.memory_space<vmem>>) attributes {dimension_semantics = [#tpu.dimension_semantics<parallel>, #tpu.dimension_semantics<arbitrary>], iteration_bounds = array<i64: 1, 2>, scalar_prefetch = 0 : i64, scratch_operands = 1 : i64, tpu.core_type = #tpu.core_type<tc>, window_params = [{transform_indices = @transform_0, window_bounds = array<i64: 2, 8, 32>}, {pipeline_mode = #tpu.pipeline_mode<synchronous>, transform_indices = @transform_1, window_bounds = array<i64: 8, 32>}, {transform_indices = @transform_2, window_bounds = array<i64: 2, 8, 1>}, {transform_indices = @transform_3, window_bounds = array<i64: 2, 1, 8>}, {transform_indices = @transform_4, window_bounds = array<i64: 1, 32, 32>}, {transform_indices = @transform_5, window_bounds = array<i64: 1, 1, 32>}, {transform_indices = @transform_6, window_bounds = array<i64: 1, 32, 32>}, {transform_indices = @transform_7, window_bounds = array<i64: 1, 1, 32>}, {transform_indices = @transform_8, window_bounds = array<i64: 1, 32, 32>}, {transform_indices = @transform_9, window_bounds = array<i64: 1, 1, 32>}, {transform_indices = @transform_10, window_bounds = array<i64: 1, 32, 32>}, {transform_indices = @transform_11, window_bounds = array<i64: 1, 1, 32>}, {transform_indices = @transform_12, window_bounds = array<i64: 1, 1, 32>}, {transform_indices = @transform_13, window_bounds = array<i64: 1, 1, 32>}, {transform_indices = @transform_14, window_bounds = array<i64: 1, 3, 32, 64>}, {transform_indices = @transform_15, window_bounds = array<i64: 1, 1, 64>}, {transform_indices = @transform_16, window_bounds = array<i64: 1, 1, 64, 32>}, {transform_indices = @transform_17, window_bounds = array<i64: 1, 1, 32>}, {transform_indices = @transform_18, window_bounds = array<i64: 1, 1, 32>}, {transform_indices = @transform_19, window_bounds = array<i64: 1, 1, 32>}, {transform_indices = @transform_20, window_bounds = array<i64: 2, 8, 32>}]} {
    %c0_i32 = arith.constant 0 : i32
    %0 = arith.cmpi eq, %arg1, %c0_i32 : i32
    %1 = arith.extui %0 : i1 to i32
    %c0_i32_0 = arith.constant 0 : i32
    %2 = arith.cmpi ne, %1, %c0_i32_0 : i32
    scf.if %2 {
      %c0_112 = arith.constant 0 : index
      %c0_113 = arith.constant 0 : index
      %c0_114 = arith.constant 0 : index
      %191 = vector.load %arg2[%c0_112, %c0_113, %c0_114] : memref<2x8x32xf32, #tpu.memory_space<vmem>>, vector<2x8x32xf32>
      %c0_115 = arith.constant 0 : index
      %c0_116 = arith.constant 0 : index
      %192 = vector.load %arg3[%c0_115, %c0_116] : memref<8x32xf32, #tpu.memory_space<vmem>>, vector<8x32xf32>
      %193 = vector.shape_cast %192 : vector<8x32xf32> to vector<1x8x32xf32>
      %194 = vector.broadcast %193 : vector<1x8x32xf32> to vector<2x8x32xf32>
      %195 = arith.addf %191, %194 : vector<2x8x32xf32>
      %c0_117 = arith.constant 0 : index
      %c0_118 = arith.constant 0 : index
      %c0_119 = arith.constant 0 : index
      %196 = vector.load %arg22[%c0_117, %c0_118, %c0_119] : memref<2x8x32xf32, #tpu.memory_space<vmem>>, vector<2x8x32xf32>
      tpu.vector_store %arg22[%c0_117, %c0_118, %c0_119], %195 {strides = array<i32>} : memref<2x8x32xf32, #tpu.memory_space<vmem>>, vector<2x8x32xf32>,
      %cst_120 = arith.constant 0.000000e+00 : f32
      %197 = vector.broadcast %cst_120 : f32 to vector<2x1x32xf32>
      %c0_121 = arith.constant 0 : index
      %c0_122 = arith.constant 0 : index
      %c0_123 = arith.constant 0 : index
      %198 = vector.load %arg23[%c0_121, %c0_122, %c0_123] : memref<2x10x32xf32, #tpu.memory_space<vmem>>, vector<2x1x32xf32>
      tpu.vector_store %arg23[%c0_121, %c0_122, %c0_123], %197 {strides = array<i32>} : memref<2x10x32xf32, #tpu.memory_space<vmem>>, vector<2x1x32xf32>,
      %cst_124 = arith.constant 0.000000e+00 : f32
      %199 = vector.broadcast %cst_124 : f32 to vector<2x1x32xf32>
      %c0_125 = arith.constant 0 : index
      %c9 = arith.constant 9 : index
      %c0_126 = arith.constant 0 : index
      %200 = vector.load %arg23[%c0_125, %c9, %c0_126] : memref<2x10x32xf32, #tpu.memory_space<vmem>>, vector<2x1x32xf32>
      tpu.vector_store %arg23[%c0_125, %c9, %c0_126], %199 {strides = array<i32>} : memref<2x10x32xf32, #tpu.memory_space<vmem>>, vector<2x1x32xf32>,
    } else {
    }
    %c0 = arith.constant 0 : index
    %c0_1 = arith.constant 0 : index
    %c0_2 = arith.constant 0 : index
    %3 = vector.load %arg22[%c0, %c0_1, %c0_2] : memref<2x8x32xf32, #tpu.memory_space<vmem>>, vector<2x8x32xf32>
    %4 = vector.shape_cast %3 : vector<2x8x32xf32> to vector<16x32xf32>
    %5 = arith.truncf %4 : vector<16x32xf32> to vector<16x32xbf16>
    %c0_3 = arith.constant 0 : index
    %c0_4 = arith.constant 0 : index
    %c0_5 = arith.constant 0 : index
    %6 = vector.load %arg4[%c0_3, %c0_4, %c0_5] : memref<2x8x1xf32, #tpu.memory_space<vmem>>, vector<2x8x1xf32>
    %cst = arith.constant 1.000000e+00 : f32
    %7 = vector.broadcast %cst : f32 to vector<2x8x1xf32>
    %8 = arith.subf %7, %6 : vector<2x8x1xf32>
    %9 = vector.shape_cast %8 : vector<2x8x1xf32> to vector<16x1xf32>
    %c0_6 = arith.constant 0 : index
    %c0_7 = arith.constant 0 : index
    %c0_8 = arith.constant 0 : index
    %10 = vector.load %arg5[%c0_6, %c0_7, %c0_8] : memref<2x1x8xf32, #tpu.memory_space<vmem>>, vector<2x1x8xf32>
    %cst_9 = arith.constant -1.000000e+09 : f32
    %11 = vector.broadcast %cst_9 : f32 to vector<2x1x8xf32>
    %12 = arith.mulf %10, %11 : vector<2x1x8xf32>
    %c0_10 = arith.constant 0 : index
    %c0_11 = arith.constant 0 : index
    %c0_12 = arith.constant 0 : index
    %13 = vector.load %arg6[%c0_10, %c0_11, %c0_12] : memref<1x32x32xbf16, #tpu.memory_space<vmem>>, vector<1x32x32xbf16>
    %14 = vector.shape_cast %13 : vector<1x32x32xbf16> to vector<32x32xbf16>
    %cst_13 = arith.constant dense<0.000000e+00> : vector<16x32xf32>
    %15 = tpu.matmul %5, %14, %cst_13 {dimension_numbers = #tpu.dot_dimension_numbers<[1], [0], [0], [1], [0, 0, 1, 1], [], []>} : vector<16x32xbf16>, vector<32x32xbf16>, vector<16x32xf32> -> vector<16x32xf32>
    %c0_14 = arith.constant 0 : index
    %c0_15 = arith.constant 0 : index
    %c0_16 = arith.constant 0 : index
    %16 = vector.load %arg7[%c0_14, %c0_15, %c0_16] : memref<1x1x32xf32, #tpu.memory_space<vmem>>, vector<1x1x32xf32>
    %17 = vector.shape_cast %16 : vector<1x1x32xf32> to vector<1x32xf32>
    %18 = vector.broadcast %17 : vector<1x32xf32> to vector<16x32xf32>
    %19 = arith.addf %15, %18 : vector<16x32xf32>
    %cst_17 = arith.constant 2.500000e-01 : f32
    %20 = vector.broadcast %cst_17 : f32 to vector<16x32xf32>
    %21 = arith.mulf %19, %20 : vector<16x32xf32>
    %c0_18 = arith.constant 0 : index
    %c0_19 = arith.constant 0 : index
    %c0_20 = arith.constant 0 : index
    %22 = vector.load %arg8[%c0_18, %c0_19, %c0_20] : memref<1x32x32xbf16, #tpu.memory_space<vmem>>, vector<1x32x32xbf16>
    %23 = vector.shape_cast %22 : vector<1x32x32xbf16> to vector<32x32xbf16>
    %cst_21 = arith.constant dense<0.000000e+00> : vector<16x32xf32>
    %24 = tpu.matmul %5, %23, %cst_21 {dimension_numbers = #tpu.dot_dimension_numbers<[1], [0], [0], [1], [0, 0, 1, 1], [], []>} : vector<16x32xbf16>, vector<32x32xbf16>, vector<16x32xf32> -> vector<16x32xf32>
    %c0_22 = arith.constant 0 : index
    %c0_23 = arith.constant 0 : index
    %c0_24 = arith.constant 0 : index
    %25 = vector.load %arg9[%c0_22, %c0_23, %c0_24] : memref<1x1x32xf32, #tpu.memory_space<vmem>>, vector<1x1x32xf32>
    %26 = vector.shape_cast %25 : vector<1x1x32xf32> to vector<1x32xf32>
    %27 = vector.broadcast %26 : vector<1x32xf32> to vector<16x32xf32>
    %28 = arith.addf %24, %27 : vector<16x32xf32>
    %c0_25 = arith.constant 0 : index
    %c0_26 = arith.constant 0 : index
    %c0_27 = arith.constant 0 : index
    %29 = vector.load %arg10[%c0_25, %c0_26, %c0_27] : memref<1x32x32xbf16, #tpu.memory_space<vmem>>, vector<1x32x32xbf16>
    %30 = vector.shape_cast %29 : vector<1x32x32xbf16> to vector<32x32xbf16>
    %cst_28 = arith.constant dense<0.000000e+00> : vector<16x32xf32>
    %31 = tpu.matmul %5, %30, %cst_28 {dimension_numbers = #tpu.dot_dimension_numbers<[1], [0], [0], [1], [0, 0, 1, 1], [], []>} : vector<16x32xbf16>, vector<32x32xbf16>, vector<16x32xf32> -> vector<16x32xf32>
    %c0_29 = arith.constant 0 : index
    %c0_30 = arith.constant 0 : index
    %c0_31 = arith.constant 0 : index
    %32 = vector.load %arg11[%c0_29, %c0_30, %c0_31] : memref<1x1x32xf32, #tpu.memory_space<vmem>>, vector<1x1x32xf32>
    %33 = vector.shape_cast %32 : vector<1x1x32xf32> to vector<1x32xf32>
    %34 = vector.broadcast %33 : vector<1x32xf32> to vector<16x32xf32>
    %35 = arith.addf %31, %34 : vector<16x32xf32>
    %36 = vector.extract_strided_slice %21 {offsets = [0, 0], sizes = [16, 16], strides = [1, 1]} : vector<16x32xf32> to vector<16x16xf32>
    %37 = vector.shape_cast %36 : vector<16x16xf32> to vector<2x8x16xf32>
    %38 = arith.truncf %37 : vector<2x8x16xf32> to vector<2x8x16xbf16>
    %39 = vector.extract_strided_slice %28 {offsets = [0, 0], sizes = [16, 16], strides = [1, 1]} : vector<16x32xf32> to vector<16x16xf32>
    %40 = vector.shape_cast %39 : vector<16x16xf32> to vector<2x8x16xf32>
    %41 = arith.truncf %40 : vector<2x8x16xf32> to vector<2x8x16xbf16>
    %42 = vector.extract_strided_slice %35 {offsets = [0, 0], sizes = [16, 16], strides = [1, 1]} : vector<16x32xf32> to vector<16x16xf32>
    %43 = vector.shape_cast %42 : vector<16x16xf32> to vector<2x8x16xf32>
    %44 = arith.truncf %43 : vector<2x8x16xf32> to vector<2x8x16xbf16>
    "tpu.trace_start"() <{level = 10 : i32, message = "bqd,bkd->bqk"}> : () -> ()
    %cst_32 = arith.constant dense<0.000000e+00> : vector<2x8x8xf32>
    %45 = tpu.matmul %38, %41, %cst_32 {dimension_numbers = #tpu.dot_dimension_numbers<[2], [2], [1], [1], [0, 0, 0, 1, 1, 1], [0], [0]>} : vector<2x8x16xbf16>, vector<2x8x16xbf16>, vector<2x8x8xf32> -> vector<2x8x8xf32>
    "tpu.trace_stop"() : () -> ()
    %46 = vector.broadcast %12 : vector<2x1x8xf32> to vector<2x8x8xf32>
    %47 = arith.addf %45, %46 : vector<2x8x8xf32>
    %cst_33 = arith.constant dense<0xFF800000> : vector<2x8xf32>
    %48 = vector.multi_reduction <maximumf>, %47, %cst_33 [2] : vector<2x8x8xf32> to vector<2x8xf32>
    %49 = vector.shape_cast %48 : vector<2x8xf32> to vector<2x8x1xf32>
    %50 = vector.broadcast %49 : vector<2x8x1xf32> to vector<2x8x8xf32>
    %51 = arith.subf %47, %50 : vector<2x8x8xf32>
    %52 = math.exp %51 : vector<2x8x8xf32>
    %cst_34 = arith.constant dense<0.000000e+00> : vector<2x8xf32>
    %53 = vector.multi_reduction <add>, %52, %cst_34 [2] : vector<2x8x8xf32> to vector<2x8xf32>
    %54 = vector.shape_cast %53 : vector<2x8xf32> to vector<2x8x1xf32>
    %55 = tpu.reciprocal %54 {approx = true} : vector<2x8x1xf32> -> vector<2x8x1xf32>
    %56 = vector.broadcast %55 : vector<2x8x1xf32> to vector<2x8x8xf32>
    %57 = arith.mulf %52, %56 : vector<2x8x8xf32>
    %58 = arith.truncf %57 : vector<2x8x8xf32> to vector<2x8x8xbf16>
    "tpu.trace_start"() <{level = 10 : i32, message = "bqk,bkd->bqd"}> : () -> ()
    %cst_35 = arith.constant dense<0.000000e+00> : vector<2x8x16xf32>
    %59 = tpu.matmul %58, %44, %cst_35 {dimension_numbers = #tpu.dot_dimension_numbers<[2], [1], [1], [2], [0, 0, 0, 1, 1, 2], [0], [0]>} : vector<2x8x8xbf16>, vector<2x8x16xbf16>, vector<2x8x16xf32> -> vector<2x8x16xf32>
    "tpu.trace_stop"() : () -> ()
    %60 = vector.shape_cast %59 : vector<2x8x16xf32> to vector<16x16xf32>
    %61 = arith.truncf %60 : vector<16x16xf32> to vector<16x16xbf16>
    %c0_36 = arith.constant 0 : index
    %c0_37 = arith.constant 0 : index
    %c0_38 = arith.constant 0 : index
    %62 = vector.load %arg12[%c0_36, %c0_37, %c0_38] : memref<1x32x32xbf16, #tpu.memory_space<vmem>>, vector<1x16x32xbf16>
    %63 = vector.shape_cast %62 : vector<1x16x32xbf16> to vector<16x32xbf16>
    %cst_39 = arith.constant dense<0.000000e+00> : vector<16x32xf32>
    %64 = tpu.matmul %61, %63, %cst_39 {dimension_numbers = #tpu.dot_dimension_numbers<[1], [0], [0], [1], [0, 0, 1, 1], [], []>} : vector<16x16xbf16>, vector<16x32xbf16>, vector<16x32xf32> -> vector<16x32xf32>
    %65 = vector.extract_strided_slice %21 {offsets = [0, 16], sizes = [16, 16], strides = [1, 1]} : vector<16x32xf32> to vector<16x16xf32>
    %66 = vector.shape_cast %65 : vector<16x16xf32> to vector<2x8x16xf32>
    %67 = arith.truncf %66 : vector<2x8x16xf32> to vector<2x8x16xbf16>
    %68 = vector.extract_strided_slice %28 {offsets = [0, 16], sizes = [16, 16], strides = [1, 1]} : vector<16x32xf32> to vector<16x16xf32>
    %69 = vector.shape_cast %68 : vector<16x16xf32> to vector<2x8x16xf32>
    %70 = arith.truncf %69 : vector<2x8x16xf32> to vector<2x8x16xbf16>
    %71 = vector.extract_strided_slice %35 {offsets = [0, 16], sizes = [16, 16], strides = [1, 1]} : vector<16x32xf32> to vector<16x16xf32>
    %72 = vector.shape_cast %71 : vector<16x16xf32> to vector<2x8x16xf32>
    %73 = arith.truncf %72 : vector<2x8x16xf32> to vector<2x8x16xbf16>
    "tpu.trace_start"() <{level = 10 : i32, message = "bqd,bkd->bqk"}> : () -> ()
    %cst_40 = arith.constant dense<0.000000e+00> : vector<2x8x8xf32>
    %74 = tpu.matmul %67, %70, %cst_40 {dimension_numbers = #tpu.dot_dimension_numbers<[2], [2], [1], [1], [0, 0, 0, 1, 1, 1], [0], [0]>} : vector<2x8x16xbf16>, vector<2x8x16xbf16>, vector<2x8x8xf32> -> vector<2x8x8xf32>
    "tpu.trace_stop"() : () -> ()
    %75 = vector.broadcast %12 : vector<2x1x8xf32> to vector<2x8x8xf32>
    %76 = arith.addf %74, %75 : vector<2x8x8xf32>
    %cst_41 = arith.constant dense<0xFF800000> : vector<2x8xf32>
    %77 = vector.multi_reduction <maximumf>, %76, %cst_41 [2] : vector<2x8x8xf32> to vector<2x8xf32>
    %78 = vector.shape_cast %77 : vector<2x8xf32> to vector<2x8x1xf32>
    %79 = vector.broadcast %78 : vector<2x8x1xf32> to vector<2x8x8xf32>
    %80 = arith.subf %76, %79 : vector<2x8x8xf32>
    %81 = math.exp %80 : vector<2x8x8xf32>
    %cst_42 = arith.constant dense<0.000000e+00> : vector<2x8xf32>
    %82 = vector.multi_reduction <add>, %81, %cst_42 [2] : vector<2x8x8xf32> to vector<2x8xf32>
    %83 = vector.shape_cast %82 : vector<2x8xf32> to vector<2x8x1xf32>
    %84 = tpu.reciprocal %83 {approx = true} : vector<2x8x1xf32> -> vector<2x8x1xf32>
    %85 = vector.broadcast %84 : vector<2x8x1xf32> to vector<2x8x8xf32>
    %86 = arith.mulf %81, %85 : vector<2x8x8xf32>
    %87 = arith.truncf %86 : vector<2x8x8xf32> to vector<2x8x8xbf16>
    "tpu.trace_start"() <{level = 10 : i32, message = "bqk,bkd->bqd"}> : () -> ()
    %cst_43 = arith.constant dense<0.000000e+00> : vector<2x8x16xf32>
    %88 = tpu.matmul %87, %73, %cst_43 {dimension_numbers = #tpu.dot_dimension_numbers<[2], [1], [1], [2], [0, 0, 0, 1, 1, 2], [0], [0]>} : vector<2x8x8xbf16>, vector<2x8x16xbf16>, vector<2x8x16xf32> -> vector<2x8x16xf32>
    "tpu.trace_stop"() : () -> ()
    %89 = vector.shape_cast %88 : vector<2x8x16xf32> to vector<16x16xf32>
    %90 = arith.truncf %89 : vector<16x16xf32> to vector<16x16xbf16>
    %c0_44 = arith.constant 0 : index
    %c16 = arith.constant 16 : index
    %c0_45 = arith.constant 0 : index
    %91 = vector.load %arg12[%c0_44, %c16, %c0_45] : memref<1x32x32xbf16, #tpu.memory_space<vmem>>, vector<1x16x32xbf16>
    %92 = vector.shape_cast %91 : vector<1x16x32xbf16> to vector<16x32xbf16>
    %cst_46 = arith.constant dense<0.000000e+00> : vector<16x32xf32>
    %93 = tpu.matmul %90, %92, %cst_46 {dimension_numbers = #tpu.dot_dimension_numbers<[1], [0], [0], [1], [0, 0, 1, 1], [], []>} : vector<16x16xbf16>, vector<16x32xbf16>, vector<16x32xf32> -> vector<16x32xf32>
    %94 = arith.addf %64, %93 : vector<16x32xf32>
    %c0_47 = arith.constant 0 : index
    %c0_48 = arith.constant 0 : index
    %c0_49 = arith.constant 0 : index
    %95 = vector.load %arg13[%c0_47, %c0_48, %c0_49] : memref<1x1x32xf32, #tpu.memory_space<vmem>>, vector<1x1x32xf32>
    %96 = vector.shape_cast %95 : vector<1x1x32xf32> to vector<1x32xf32>
    %97 = vector.broadcast %96 : vector<1x32xf32> to vector<16x32xf32>
    %98 = arith.addf %94, %97 : vector<16x32xf32>
    %99 = arith.addf %98, %4 : vector<16x32xf32>
    %c0_50 = arith.constant 0 : index
    %c0_51 = arith.constant 0 : index
    %c0_52 = arith.constant 0 : index
    %100 = vector.load %arg14[%c0_50, %c0_51, %c0_52] : memref<1x1x32xf32, #tpu.memory_space<vmem>>, vector<1x1x32xf32>
    %101 = vector.shape_cast %100 : vector<1x1x32xf32> to vector<1x32xf32>
    %c0_53 = arith.constant 0 : index
    %c0_54 = arith.constant 0 : index
    %c0_55 = arith.constant 0 : index
    %102 = vector.load %arg15[%c0_53, %c0_54, %c0_55] : memref<1x1x32xf32, #tpu.memory_space<vmem>>, vector<1x1x32xf32>
    %103 = vector.shape_cast %102 : vector<1x1x32xf32> to vector<1x32xf32>
    %cst_56 = arith.constant dense<0.000000e+00> : vector<16xf32>
    %104 = vector.multi_reduction <add>, %99, %cst_56 [1] : vector<16x32xf32> to vector<16xf32>
    %105 = vector.shape_cast %104 : vector<16xf32> to vector<16x1xf32>
    %cst_57 = arith.constant 3.200000e+01 : f32
    %106 = vector.broadcast %cst_57 : f32 to vector<16x1xf32>
    %107 = arith.divf %105, %106 : vector<16x1xf32>
    %108 = vector.broadcast %107 : vector<16x1xf32> to vector<16x32xf32>
    %109 = arith.subf %99, %108 : vector<16x32xf32>
    %110 = arith.mulf %109, %109 : vector<16x32xf32>
    %cst_58 = arith.constant dense<0.000000e+00> : vector<16xf32>
    %111 = vector.multi_reduction <add>, %110, %cst_58 [1] : vector<16x32xf32> to vector<16xf32>
    %112 = vector.shape_cast %111 : vector<16xf32> to vector<16x1xf32>
    %cst_59 = arith.constant 3.200000e+01 : f32
    %113 = vector.broadcast %cst_59 : f32 to vector<16x1xf32>
    %114 = arith.divf %112, %113 : vector<16x1xf32>
    %cst_60 = arith.constant 9.99999974E-6 : f32
    %115 = vector.broadcast %cst_60 : f32 to vector<16x1xf32>
    %116 = arith.addf %114, %115 : vector<16x1xf32>
    %117 = math.rsqrt %116 : vector<16x1xf32>
    %118 = vector.broadcast %117 : vector<16x1xf32> to vector<16x32xf32>
    %119 = arith.mulf %109, %118 : vector<16x32xf32>
    %120 = vector.broadcast %101 : vector<1x32xf32> to vector<16x32xf32>
    %121 = arith.mulf %119, %120 : vector<16x32xf32>
    %122 = vector.broadcast %103 : vector<1x32xf32> to vector<16x32xf32>
    %123 = arith.addf %121, %122 : vector<16x32xf32>
    %124 = vector.broadcast %9 : vector<16x1xf32> to vector<16x32xf32>
    %125 = arith.mulf %123, %124 : vector<16x32xf32>
    %c0_61 = arith.constant 0 : index
    %c0_62 = arith.constant 0 : index
    %c0_63 = arith.constant 0 : index
    %126 = vector.load %arg17[%c0_61, %c0_62, %c0_63] : memref<1x1x64xf32, #tpu.memory_space<vmem>>, vector<1x1x64xf32>
    %127 = vector.shape_cast %126 : vector<1x1x64xf32> to vector<1x64xf32>
    %128 = vector.shape_cast %125 : vector<16x32xf32> to vector<2x8x32xf32>
    %c0_64 = arith.constant 0 : index
    %c1 = arith.constant 1 : index
    %c0_65 = arith.constant 0 : index
    %129 = vector.load %arg23[%c0_64, %c1, %c0_65] : memref<2x10x32xf32, #tpu.memory_space<vmem>>, vector<2x8x32xf32>
    tpu.vector_store %arg23[%c0_64, %c1, %c0_65], %128 {strides = array<i32>} : memref<2x10x32xf32, #tpu.memory_space<vmem>>, vector<2x8x32xf32>,
    %c0_66 = arith.constant 0 : index
    %c0_67 = arith.constant 0 : index
    %c0_68 = arith.constant 0 : index
    %130 = vector.load %arg23[%c0_66, %c0_67, %c0_68] : memref<2x10x32xf32, #tpu.memory_space<vmem>>, vector<2x8x32xf32>
    %131 = vector.shape_cast %130 : vector<2x8x32xf32> to vector<16x32xf32>
    %132 = arith.truncf %131 : vector<16x32xf32> to vector<16x32xbf16>
    %c0_69 = arith.constant 0 : index
    %c0_70 = arith.constant 0 : index
    %c0_71 = arith.constant 0 : index
    %c0_72 = arith.constant 0 : index
    %133 = vector.load %arg16[%c0_69, %c0_70, %c0_71, %c0_72] : memref<1x3x32x64xbf16, #tpu.memory_space<vmem>>, vector<1x1x32x64xbf16>
    %134 = vector.shape_cast %133 : vector<1x1x32x64xbf16> to vector<32x64xbf16>
    %cst_73 = arith.constant dense<0.000000e+00> : vector<16x64xf32>
    %135 = tpu.matmul %132, %134, %cst_73 {dimension_numbers = #tpu.dot_dimension_numbers<[1], [0], [0], [1], [0, 0, 1, 1], [], []>} : vector<16x32xbf16>, vector<32x64xbf16>, vector<16x64xf32> -> vector<16x64xf32>
    %136 = vector.broadcast %127 : vector<1x64xf32> to vector<16x64xf32>
    %137 = arith.addf %135, %136 : vector<16x64xf32>
    %c0_74 = arith.constant 0 : index
    %c1_75 = arith.constant 1 : index
    %c0_76 = arith.constant 0 : index
    %138 = vector.load %arg23[%c0_74, %c1_75, %c0_76] : memref<2x10x32xf32, #tpu.memory_space<vmem>>, vector<2x8x32xf32>
    %139 = vector.shape_cast %138 : vector<2x8x32xf32> to vector<16x32xf32>
    %140 = arith.truncf %139 : vector<16x32xf32> to vector<16x32xbf16>
    %c0_77 = arith.constant 0 : index
    %c1_78 = arith.constant 1 : index
    %c0_79 = arith.constant 0 : index
    %c0_80 = arith.constant 0 : index
    %141 = vector.load %arg16[%c0_77, %c1_78, %c0_79, %c0_80] : memref<1x3x32x64xbf16, #tpu.memory_space<vmem>>, vector<1x1x32x64xbf16>
    %142 = vector.shape_cast %141 : vector<1x1x32x64xbf16> to vector<32x64xbf16>
    %cst_81 = arith.constant dense<0.000000e+00> : vector<16x64xf32>
    %143 = tpu.matmul %140, %142, %cst_81 {dimension_numbers = #tpu.dot_dimension_numbers<[1], [0], [0], [1], [0, 0, 1, 1], [], []>} : vector<16x32xbf16>, vector<32x64xbf16>, vector<16x64xf32> -> vector<16x64xf32>
    %144 = arith.addf %137, %143 : vector<16x64xf32>
    %c0_82 = arith.constant 0 : index
    %c2 = arith.constant 2 : index
    %c0_83 = arith.constant 0 : index
    %145 = vector.load %arg23[%c0_82, %c2, %c0_83] : memref<2x10x32xf32, #tpu.memory_space<vmem>>, vector<2x8x32xf32>
    %146 = vector.shape_cast %145 : vector<2x8x32xf32> to vector<16x32xf32>
    %147 = arith.truncf %146 : vector<16x32xf32> to vector<16x32xbf16>
    %c0_84 = arith.constant 0 : index
    %c2_85 = arith.constant 2 : index
    %c0_86 = arith.constant 0 : index
    %c0_87 = arith.constant 0 : index
    %148 = vector.load %arg16[%c0_84, %c2_85, %c0_86, %c0_87] : memref<1x3x32x64xbf16, #tpu.memory_space<vmem>>, vector<1x1x32x64xbf16>
    %149 = vector.shape_cast %148 : vector<1x1x32x64xbf16> to vector<32x64xbf16>
    %cst_88 = arith.constant dense<0.000000e+00> : vector<16x64xf32>
    %150 = tpu.matmul %147, %149, %cst_88 {dimension_numbers = #tpu.dot_dimension_numbers<[1], [0], [0], [1], [0, 0, 1, 1], [], []>} : vector<16x32xbf16>, vector<32x64xbf16>, vector<16x64xf32> -> vector<16x64xf32>
    %151 = arith.addf %144, %150 : vector<16x64xf32>
    %cst_89 = arith.constant 0.000000e+00 : f32
    %152 = vector.broadcast %cst_89 : f32 to vector<16x64xf32>
    %153 = arith.maximumf %151, %152 : vector<16x64xf32>
    %c0_90 = arith.constant 0 : index
    %c0_91 = arith.constant 0 : index
    %c0_92 = arith.constant 0 : index
    %154 = vector.load %arg19[%c0_90, %c0_91, %c0_92] : memref<1x1x32xf32, #tpu.memory_space<vmem>>, vector<1x1x32xf32>
    %155 = vector.shape_cast %154 : vector<1x1x32xf32> to vector<1x32xf32>
    %156 = arith.truncf %153 : vector<16x64xf32> to vector<16x64xbf16>
    %c0_93 = arith.constant 0 : index
    %c0_94 = arith.constant 0 : index
    %c0_95 = arith.constant 0 : index
    %c0_96 = arith.constant 0 : index
    %157 = vector.load %arg18[%c0_93, %c0_94, %c0_95, %c0_96] : memref<1x1x64x32xbf16, #tpu.memory_space<vmem>>, vector<1x1x64x32xbf16>
    %158 = vector.shape_cast %157 : vector<1x1x64x32xbf16> to vector<64x32xbf16>
    %cst_97 = arith.constant dense<0.000000e+00> : vector<16x32xf32>
    %159 = tpu.matmul %156, %158, %cst_97 {dimension_numbers = #tpu.dot_dimension_numbers<[1], [0], [0], [1], [0, 0, 1, 1], [], []>} : vector<16x64xbf16>, vector<64x32xbf16>, vector<16x32xf32> -> vector<16x32xf32>
    %160 = vector.broadcast %155 : vector<1x32xf32> to vector<16x32xf32>
    %161 = arith.addf %159, %160 : vector<16x32xf32>
    %162 = arith.addf %161, %125 : vector<16x32xf32>
    %c0_98 = arith.constant 0 : index
    %c0_99 = arith.constant 0 : index
    %c0_100 = arith.constant 0 : index
    %163 = vector.load %arg20[%c0_98, %c0_99, %c0_100] : memref<1x1x32xf32, #tpu.memory_space<vmem>>, vector<1x1x32xf32>
    %164 = vector.shape_cast %163 : vector<1x1x32xf32> to vector<1x32xf32>
    %c0_101 = arith.constant 0 : index
    %c0_102 = arith.constant 0 : index
    %c0_103 = arith.constant 0 : index
    %165 = vector.load %arg21[%c0_101, %c0_102, %c0_103] : memref<1x1x32xf32, #tpu.memory_space<vmem>>, vector<1x1x32xf32>
    %166 = vector.shape_cast %165 : vector<1x1x32xf32> to vector<1x32xf32>
    %cst_104 = arith.constant dense<0.000000e+00> : vector<16xf32>
    %167 = vector.multi_reduction <add>, %162, %cst_104 [1] : vector<16x32xf32> to vector<16xf32>
    %168 = vector.shape_cast %167 : vector<16xf32> to vector<16x1xf32>
    %cst_105 = arith.constant 3.200000e+01 : f32
    %169 = vector.broadcast %cst_105 : f32 to vector<16x1xf32>
    %170 = arith.divf %168, %169 : vector<16x1xf32>
    %171 = vector.broadcast %170 : vector<16x1xf32> to vector<16x32xf32>
    %172 = arith.subf %162, %171 : vector<16x32xf32>
    %173 = arith.mulf %172, %172 : vector<16x32xf32>
    %cst_106 = arith.constant dense<0.000000e+00> : vector<16xf32>
    %174 = vector.multi_reduction <add>, %173, %cst_106 [1] : vector<16x32xf32> to vector<16xf32>
    %175 = vector.shape_cast %174 : vector<16xf32> to vector<16x1xf32>
    %cst_107 = arith.constant 3.200000e+01 : f32
    %176 = vector.broadcast %cst_107 : f32 to vector<16x1xf32>
    %177 = arith.divf %175, %176 : vector<16x1xf32>
    %cst_108 = arith.constant 9.99999974E-6 : f32
    %178 = vector.broadcast %cst_108 : f32 to vector<16x1xf32>
    %179 = arith.addf %177, %178 : vector<16x1xf32>
    %180 = math.rsqrt %179 : vector<16x1xf32>
    %181 = vector.broadcast %180 : vector<16x1xf32> to vector<16x32xf32>
    %182 = arith.mulf %172, %181 : vector<16x32xf32>
    %183 = vector.broadcast %164 : vector<1x32xf32> to vector<16x32xf32>
    %184 = arith.mulf %182, %183 : vector<16x32xf32>
    %185 = vector.broadcast %166 : vector<1x32xf32> to vector<16x32xf32>
    %186 = arith.addf %184, %185 : vector<16x32xf32>
    %187 = vector.broadcast %9 : vector<16x1xf32> to vector<16x32xf32>
    %188 = arith.mulf %186, %187 : vector<16x32xf32>
    %189 = vector.shape_cast %188 : vector<16x32xf32> to vector<2x8x32xf32>
    %c0_109 = arith.constant 0 : index
    %c0_110 = arith.constant 0 : index
    %c0_111 = arith.constant 0 : index
    %190 = vector.load %arg22[%c0_109, %c0_110, %c0_111] : memref<2x8x32xf32, #tpu.memory_space<vmem>>, vector<2x8x32xf32>
    tpu.vector_store %arg22[%c0_109, %c0_110, %c0_111], %189 {strides = array<i32>} : memref<2x8x32xf32, #tpu.memory_space<vmem>>, vector<2x8x32xf32>,
    return
  }
  func.func @transform_0(%arg0: i32, %arg1: i32) -> (i32, i32, i32) {
    %c0_i32 = arith.constant 0 : i32
    %c0_i32_0 = arith.constant 0 : i32
    %c0_i32_1 = arith.constant 0 : i32
    return %arg0, %c0_i32, %c0_i32_0 : i32, i32, i32
  }
  func.func @transform_1(%arg0: i32, %arg1: i32) -> (i32, i32) {
    %c0_i32 = arith.constant 0 : i32
    %c0_i32_0 = arith.constant 0 : i32
    %c0_i32_1 = arith.constant 0 : i32
    return %c0_i32, %c0_i32_0 : i32, i32
  }
  func.func @transform_2(%arg0: i32, %arg1: i32) -> (i32, i32, i32) {
    %c0_i32 = arith.constant 0 : i32
    %c0_i32_0 = arith.constant 0 : i32
    %c0_i32_1 = arith.constant 0 : i32
    return %arg0, %c0_i32, %c0_i32_0 : i32, i32, i32
  }
  func.func @transform_3(%arg0: i32, %arg1: i32) -> (i32, i32, i32) {
    %c0_i32 = arith.constant 0 : i32
    %c0_i32_0 = arith.constant 0 : i32
    %c0_i32_1 = arith.constant 0 : i32
    return %arg0, %c0_i32, %c0_i32_0 : i32, i32, i32
  }
  func.func @transform_4(%arg0: i32, %arg1: i32) -> (i32, i32, i32) {
    %c0_i32 = arith.constant 0 : i32
    %c0_i32_0 = arith.constant 0 : i32
    %c0_i32_1 = arith.constant 0 : i32
    return %arg1, %c0_i32, %c0_i32_0 : i32, i32, i32
  }
  func.func @transform_5(%arg0: i32, %arg1: i32) -> (i32, i32, i32) {
    %c0_i32 = arith.constant 0 : i32
    %c0_i32_0 = arith.constant 0 : i32
    %c0_i32_1 = arith.constant 0 : i32
    return %arg1, %c0_i32, %c0_i32_0 : i32, i32, i32
  }
  func.func @transform_6(%arg0: i32, %arg1: i32) -> (i32, i32, i32) {
    %c0_i32 = arith.constant 0 : i32
    %c0_i32_0 = arith.constant 0 : i32
    %c0_i32_1 = arith.constant 0 : i32
    return %arg1, %c0_i32, %c0_i32_0 : i32, i32, i32
  }
  func.func @transform_7(%arg0: i32, %arg1: i32) -> (i32, i32, i32) {
    %c0_i32 = arith.constant 0 : i32
    %c0_i32_0 = arith.constant 0 : i32
    %c0_i32_1 = arith.constant 0 : i32
    return %arg1, %c0_i32, %c0_i32_0 : i32, i32, i32
  }
  func.func @transform_8(%arg0: i32, %arg1: i32) -> (i32, i32, i32) {
    %c0_i32 = arith.constant 0 : i32
    %c0_i32_0 = arith.constant 0 : i32
    %c0_i32_1 = arith.constant 0 : i32
    return %arg1, %c0_i32, %c0_i32_0 : i32, i32, i32
  }
  func.func @transform_9(%arg0: i32, %arg1: i32) -> (i32, i32, i32) {
    %c0_i32 = arith.constant 0 : i32
    %c0_i32_0 = arith.constant 0 : i32
    %c0_i32_1 = arith.constant 0 : i32
    return %arg1, %c0_i32, %c0_i32_0 : i32, i32, i32
  }
  func.func @transform_10(%arg0: i32, %arg1: i32) -> (i32, i32, i32) {
    %c0_i32 = arith.constant 0 : i32
    %c0_i32_0 = arith.constant 0 : i32
    %c0_i32_1 = arith.constant 0 : i32
    return %arg1, %c0_i32, %c0_i32_0 : i32, i32, i32
  }
  func.func @transform_11(%arg0: i32, %arg1: i32) -> (i32, i32, i32) {
    %c0_i32 = arith.constant 0 : i32
    %c0_i32_0 = arith.constant 0 : i32
    %c0_i32_1 = arith.constant 0 : i32
    return %arg1, %c0_i32, %c0_i32_0 : i32, i32, i32
  }
  func.func @transform_12(%arg0: i32, %arg1: i32) -> (i32, i32, i32) {
    %c0_i32 = arith.constant 0 : i32
    %c0_i32_0 = arith.constant 0 : i32
    %c0_i32_1 = arith.constant 0 : i32
    return %arg1, %c0_i32, %c0_i32_0 : i32, i32, i32
  }
  func.func @transform_13(%arg0: i32, %arg1: i32) -> (i32, i32, i32) {
    %c0_i32 = arith.constant 0 : i32
    %c0_i32_0 = arith.constant 0 : i32
    %c0_i32_1 = arith.constant 0 : i32
    return %arg1, %c0_i32, %c0_i32_0 : i32, i32, i32
  }
  func.func @transform_14(%arg0: i32, %arg1: i32) -> (i32, i32, i32, i32) {
    %c0_i32 = arith.constant 0 : i32
    %c0_i32_0 = arith.constant 0 : i32
    %c0_i32_1 = arith.constant 0 : i32
    %c0_i32_2 = arith.constant 0 : i32
    return %arg1, %c0_i32, %c0_i32_0, %c0_i32_1 : i32, i32, i32, i32
  }
  func.func @transform_15(%arg0: i32, %arg1: i32) -> (i32, i32, i32) {
    %c0_i32 = arith.constant 0 : i32
    %c0_i32_0 = arith.constant 0 : i32
    %c0_i32_1 = arith.constant 0 : i32
    return %arg1, %c0_i32, %c0_i32_0 : i32, i32, i32
  }
  func.func @transform_16(%arg0: i32, %arg1: i32) -> (i32, i32, i32, i32) {
    %c0_i32 = arith.constant 0 : i32
    %c0_i32_0 = arith.constant 0 : i32
    %c0_i32_1 = arith.constant 0 : i32
    %c0_i32_2 = arith.constant 0 : i32
    return %arg1, %c0_i32, %c0_i32_0, %c0_i32_1 : i32, i32, i32, i32
  }
  func.func @transform_17(%arg0: i32, %arg1: i32) -> (i32, i32, i32) {
    %c0_i32 = arith.constant 0 : i32
    %c0_i32_0 = arith.constant 0 : i32
    %c0_i32_1 = arith.constant 0 : i32
    return %arg1, %c0_i32, %c0_i32_0 : i32, i32, i32
  }
  func.func @transform_18(%arg0: i32, %arg1: i32) -> (i32, i32, i32) {
    %c0_i32 = arith.constant 0 : i32
    %c0_i32_0 = arith.constant 0 : i32
    %c0_i32_1 = arith.constant 0 : i32
    return %arg1, %c0_i32, %c0_i32_0 : i32, i32, i32
  }
  func.func @transform_19(%arg0: i32, %arg1: i32) -> (i32, i32, i32) {
    %c0_i32 = arith.constant 0 : i32
    %c0_i32_0 = arith.constant 0 : i32
    %c0_i32_1 = arith.constant 0 : i32
    return %arg1, %c0_i32, %c0_i32_0 : i32, i32, i32
  }
  func.func @transform_20(%arg0: i32, %arg1: i32) -> (i32, i32, i32) {
    %c0_i32 = arith.constant 0 : i32
    %c0_i32_0 = arith.constant 0 : i32
    %c0_i32_1 = arith.constant 0 : i32
    return %arg0, %c0_i32, %c0_i32_0 : i32, i32, i32
  }
}

</mosaic_0001>

<bundles_post_ra>
// kernel: tpu_custom_call.1
= control target key start
LH: loop header
LB: loop body
LE: loop exit
PB: predicated region body
PF: predicated region fallthrough
CT: control target
= control target key end

     0   :  { %s4416_s0 = inlined_call_operand.hbm [shape: f32[2,8,32], index: 0, kind: input, shape index: {}]   ;;  %s4417_s1 = inlined_call_operand.vmem [shape: f32[8,32], index: 1, kind: input, shape index: {}]   ;;  %s4418_s2 = inlined_call_operand.vmem [shape: f32[2,8,1], index: 2, kind: input, shape index: {}]   ;;  %s4419_s3 = inlined_call_operand.vmem [shape: f32[2,1,8], index: 3, kind: input, shape index: {}]   ;;  %s4420_s4 = inlined_call_operand.vmem [shape: bf16[2,32,32], index: 4, kind: input, shape index: {}]   ;;  %s4421_s5 = inlined_call_operand.hbm [shape: f32[2,1,32], index: 5, kind: input, shape index: {}]   ;;  %s4422_s6 = inlined_call_operand.hbm [shape: bf16[2,32,32], index: 6, kind: input, shape index: {}]   ;;  %s4423_s7 = inlined_call_operand.hbm [shape: f32[2,1,32], index: 7, kind: input, shape index: {}]   ;;  %s4424_s8 = inlined_call_operand.hbm [shape: bf16[2,32,32], index: 8, kind: input, shape index: {}]   ;;  %s4425_s9 = inlined_call_operand.hbm [shape: f32[2,1,32], index: 9, kind: input, shape index: {}]   ;;  %s4426_s10 = inlined_call_operand.hbm [shape: bf16[2,32,32], index: 10, kind: input, shape index: {}]   ;;  %s4427_s11 = inlined_call_operand.hbm [shape: f32[2,1,32], index: 11, kind: input, shape index: {}]   ;;  %s4428_s12 = inlined_call_operand.hbm [shape: f32[2,1,32], index: 12, kind: input, shape index: {}]   ;;  %s4429_s13 = inlined_call_operand.hbm [shape: f32[2,1,32], index: 13, kind: input, shape index: {}]   ;;  %s4430_s14 = inlined_call_operand.vmem [shape: bf16[2,3,32,64], index: 14, kind: input, shape index: {}]   ;;  %s4431_s15 = inlined_call_operand.hbm [shape: f32[2,1,64], index: 15, kind: input, shape index: {}]   ;;  %s4432_s16 = inlined_call_operand.vmem [shape: bf16[2,1,64,32], index: 16, kind: input, shape index: {}]   ;;  %s4433_s17 = inlined_call_operand.vmem [shape: f32[2,1,32], index: 17, kind: input, shape index: {}]   ;;  %s4434_s18 = inlined_call_operand.vmem [shape: f32[2,1,32], index: 18, kind: input, shape index: {}]   ;;  %s4435_s19 = inlined_call_operand.vmem [shape: f32[2,1,32], index: 19, kind: input, shape index: {}]   ;;  %s4436_s20 = inlined_call_operand.hbm [shape: f32[2,8,32], index: 20, kind: output, shape index: {}]  }
   0x1   :  { %4455 = sst [smem:[#allocation35_spill]] %s4416_s0 }
   0x2   :  { %4456 = sst [smem:[#allocation36_spill]] %s4417_s1 }
   0x3   :  { %4457 = sst [smem:[#allocation37_spill]] %s4418_s2 }
   0x4   :  { %4458 = sst [smem:[#allocation38_spill]] %s4419_s3 }
   0x5   :  { %4459 = sst [smem:[#allocation39_spill]] %s4420_s4 }
   0x6   :  { %4460 = sst [smem:[#allocation40_spill]] %s4421_s5 }
   0x7   :  { %4461 = sst [smem:[#allocation41_spill]] %s4422_s6 }
   0x8   :  { %4462 = sst [smem:[#allocation42_spill]] %s4423_s7 }
   0x9   :  { %4463 = sst [smem:[#allocation43_spill]] %s4424_s8 }
   0xa   :  { %4464 = sst [smem:[#allocation44_spill]] %s4425_s9 }
   0xb   :  { %4465 = sst [smem:[#allocation45_spill]] %s4426_s10 }
   0xc   :  { %4466 = sst [smem:[#allocation46_spill]] %s4427_s11 }
   0xd   :  { %4467 = sst [smem:[#allocation47_spill]] %s4429_s13 }
   0xe   :  { %4468 = sst [smem:[#allocation48_spill]] %s4430_s14 }
   0xf   :  { %4469 = sst [smem:[#allocation49_spill]] %s4432_s16 }
  0x10   :  { %4470 = sst [smem:[#allocation50_spill]] %s4433_s17 }
  0x11   :  { %4471 = sst [smem:[#allocation51_spill]] %s4434_s18 }
  0x12   :  { %4472 = sst [smem:[#allocation52_spill]] %s4435_s19 }
  0x13   :  { %4473 = sst [smem:[#allocation53_spill]] %s4436_s20 }
  0x14   :  { %25 = vsyncpa [#allocation4], 0 }
  0x15   :  { %26 = vsyncpa [#allocation7], 0 }
  0x16   :  { %28 = vsyncpa [#allocation7 + $0x1], 0 }
  0x17   :  { %29 = vsyncpa [#allocation10], 0 }
  0x18   :  { %31 = vsyncpa [#allocation10 + $0x1], 0 }
  0x19   :  { %32 = vsyncpa [#allocation13], 0 }
  0x1a   :  { %34 = vsyncpa [#allocation13 + $0x1], 0 }
  0x1b   :  { %35 = vsyncpa [#allocation16], 0 }
  0x1c   :  { %37 = vsyncpa [#allocation16 + $0x1], 0 }
  0x1d   :  { %38 = vsyncpa [#allocation19], 0 }
  0x1e   :  { %40 = vsyncpa [#allocation19 + $0x1], 0 }
  0x1f   :  { %41 = vsyncpa [#allocation5], 0  ;;  %s3669_s1 = smov 0   ;;  %s3671_s22 = smov 0  }
  0x20   :  { %s3673_s23 = smov 0   ;;  %s3675_s24 = smov 0  }
  0x21   :  { %s3677_s2 = smov 0   ;;  %s3679_s25 = smov 0  }
  0x22 LB: > { %4474 = sst [smem:[#allocation29_spill]] %s3527_s23  ;;  %s56_s3 = sadd.s32 1, %s3535_s2  ;;  %s3539_s25 = sphi %s3679_s25, %s47_s25   ;;  %s3535_s2 = sphi %s3677_s2, %s4547_s2   ;;  %s3531_s24 = sphi %s3675_s24, %s4546_s24   ;;  %s3527_s23 = sphi %s3673_s23, %s4550_s23   ;;  %s3523_s22 = sphi %s3671_s22, %s4549_s22   ;;  %s3519_s1 = sphi %s3669_s1, %s4548_s1  }
  0x23   : > { %4475 = sst [smem:[#allocation30_spill]] %s3531_s24  ;;  %s191_s26 = sadd.s32 1, %s3527_s23 }
  0x24   : > { %4476 = sst [smem:[#allocation31_spill]] %s3535_s2  ;;  %p57_p0 = scmp.ge.s32.totalorder %s56_s3, 2 }
  0x25   : > { %4477 = sst [smem:[#allocation32_spill]] %s3539_s25  ;;  %p198_p1 = scmp.ne.s32.totalorder %s3527_s23, %s3523_s22 }
  0x26   : > { %p199_p2 = scmp.eq.s32.totalorder %s3539_s25, 0  ;;  %s4552_s3 = smov (%p57_p0, %s56_s3), 0 }
  0x27   : > { %4478 = sst [smem:[#allocation33_spill]] %s4552_s3  ;;  %p3002_p4 = scmp.lt.s32.totalorder %s3539_s25, 2 }
  0x28   : > { %p200_p3 = por %p199_p2, %p198_p1  ;;  %s188_s27 = ssub.s32 %s3535_s2, %s4552_s3 }
  0x29   : > { %s3710_s28 = sand.u32 1, %s3539_s25   ;;  %p189_p5 = scmp.eq.s32.totalorder %s188_s27, 0 }
  0x2a   : > { %s3713_s4 = sand.u32 1, %s3527_s23   ;;  %s3716_s29 = sshll.u32 %s3535_s2, 4 }
  0x2b   : > { %s3719_s30 = scalar_select %p189_p5, %s3527_s23, %s191_s26  }
  0x2c   : > { %s4480_s5 = sld [smem:[#allocation40_spill]]  ;;  %s665_s3 = scalar_lea.vmem [#allocation6], %s3713_s4 }
  0x2d   : > { %4479 = sst [smem:[#allocation34_spill]] %s3719_s30  ;;  %s672_s19 = sshll.u32 %s665_s3, 4  ;;  %s3732_s19 = int_to_ptr.vmem [resolvable:$true] %s672_s19 }
  0x2e   : > { %p3728_p6 = pnand %p3002_p4, %p200_p3 }
  0x30   : > { %s4481_s27 = scalar_select %p3728_p6, 1, 0 }
  0x31   : > { %p3739_p8 = pneg %p3728_p6 }
  0x32   : > { %s3725_s20 = scalar_lea.hbm %s4480_s5, %s3716_s29  ;;  %s3116_s23 = scalar_lea.hbm %s4480_s5, 32 }
  0x33   : > { %s3111_s30 = scalar_lea.hbm %s3725_s20, 16  ;;  %p3117_p11 = scmp.lt.u32.totalorder %s3725_s20, %s4480_s5 }
  0x34   : > { %p3112_p7 = scmp.ne.s32.totalorder %s3725_s20, %s3111_s30  ;;  %p3118_p12 = scmp.lt.u32.totalorder %s3116_s23, %s3111_s30 }
  0x35   : > { %s4482_s0 = scalar_select %p3739_p8, 1, 0 }
  0x36   : > { %p3114_p9 = pnand %p3739_p8, %p3112_p7  ;;  %p3119_p13 = por %p3118_p12, %p3117_p11 }
  0x37   : > { %p3120_p0 = scmp.lt.u32.totalorder %s3111_s30, %s3725_s20 }
  0x38   : > { %p3115_p10 = pneg %p3114_p9 }
  0x39   : > { %p3121_p1 = por %p3120_p0, %p3119_p13 }
  0x3b   : > { %p3122_p2 = pnand %p3121_p1, %p3115_p10 }
  0x3d   : > { %3125 = shalt.err (!%p3122_p2)
}
  0x3e   : > { %s3126_s26 = scalar_lea.vmem %s3732_s19, 16  ;;  %s3541_s3 = smov [#allocation6]  }
  0x3f   : > { %p3127_p3 = scmp.ne.s32.totalorder %s3732_s19, %s3126_s26  ;;  %s3131_s21 = sshll.u32 %s3541_s3, 4  ;;  %s3132_s21 = int_to_ptr.vmem [resolvable:$false] %s3131_s21 }
  0x40   : > { %s3133_s17 = scalar_lea.vmem %s3132_s21, 32  ;;  %p3134_p7 = scmp.lt.s32.totalorder %s3732_s19, %s3132_s21 }
  0x41   : > { %p3129_p4 = pnand %p3127_p3, %p3739_p8  ;;  %p3135_p9 = scmp.lt.s32.totalorder %s3133_s17, %s3126_s26 }
  0x43   : > { %p3130_p5 = pneg %p3129_p4  ;;  %p3136_p11 = por %p3135_p9, %p3134_p7 }
  0x45   : > { %p3137_p12 = pnand %p3136_p11, %p3130_p5 }
  0x47   : > { %3140 = shalt.err (!%p3137_p12)
}
  0x48   : > { %s4483_s18 = scalar_lea.sflag [#allocation7], %s3710_s28  ;;  %s4484_s7 = sld [smem:[#allocation42_spill]] }
  0x49   : > { %2973 = dma.hbm_to_vmem [thread:$0]  (!%p3728_p6), %s3725_s20, 16, %s3732_s19, %s4483_s18  }
  0x4a   : > { %s703_s26 = scalar_lea.vmem [#allocation9], %s3713_s4 }
  0x4b   : > { %s710_s21 = sshll.u32 %s703_s26, 4  ;;  %s711_s21 = int_to_ptr.vmem [resolvable:$true] %s710_s21 }
  0x4e   : > { %s3768_s3 = scalar_lea.hbm %s4484_s7, %s3716_s29  ;;  %s3146_s20 = scalar_lea.hbm %s4484_s7, 32 }
  0x4f   : > { %s3141_s5 = scalar_lea.hbm %s3768_s3, 16  ;;  %p3147_p1 = scmp.lt.u32.totalorder %s3768_s3, %s4484_s7 }
  0x50   : > { %p3142_p10 = scmp.ne.s32.totalorder %s3768_s3, %s3141_s5  ;;  %p3148_p2 = scmp.lt.u32.totalorder %s3146_s20, %s3141_s5 }
  0x51   : > { %p3150_p4 = scmp.lt.u32.totalorder %s3141_s5, %s3768_s3 }
  0x52   : > { %p3144_p13 = pnand %p3142_p10, %p3739_p8  ;;  %p3149_p3 = por %p3148_p2, %p3147_p1 }
  0x54   : > { %p3145_p0 = pneg %p3144_p13  ;;  %p3151_p5 = por %p3150_p4, %p3149_p3 }
  0x56   : > { %p3152_p7 = pnand %p3151_p5, %p3145_p0 }
  0x58   : > { %3155 = shalt.err (!%p3152_p7)
}
  0x59   : > { %s3156_s30 = scalar_lea.vmem %s711_s21, 16  ;;  %s3542_s26 = smov [#allocation9]  }
  0x5a   : > { %p3157_p9 = scmp.ne.s32.totalorder %s711_s21, %s3156_s30  ;;  %s3161_s17 = sshll.u32 %s3542_s26, 4  ;;  %s3162_s17 = int_to_ptr.vmem [resolvable:$false] %s3161_s17 }
  0x5b   : > { %s3163_s16 = scalar_lea.vmem %s3162_s17, 32  ;;  %p3164_p10 = scmp.lt.s32.totalorder %s711_s21, %s3162_s17 }
  0x5c   : > { %p3159_p11 = pnand %p3157_p9, %p3739_p8  ;;  %p3165_p13 = scmp.lt.s32.totalorder %s3163_s16, %s3156_s30 }
  0x5e   : > { %p3160_p12 = pneg %p3159_p11  ;;  %p3166_p6 = por %p3165_p13, %p3164_p10 }
  0x60   : > { %p3167_p1 = pnand %p3166_p6, %p3160_p12 }
  0x62   : > { %3170 = shalt.err (!%p3167_p1)
}
  0x63   : > { %p4485_p2 = scmp.ne.s32.totalorder %s4481_s27, 0  ;;  %s4486_s5 = scalar_lea.sflag [#allocation10], %s3710_s28 }
  0x64   : > { %s4487_s9 = sld [smem:[#allocation44_spill]]  ;;  %s741_s17 = scalar_lea.vmem [#allocation12], %s3713_s4 }
  0x65   : > { %2979 = dma.hbm_to_vmem [thread:$0]  (!%p4485_p2), %s3768_s3, 16, %s711_s21, %s4486_s5  }
  0x66   : > { %s748_s23 = sshll.u32 %s741_s17, 4  ;;  %s749_s23 = int_to_ptr.vmem [resolvable:$true] %s748_s23 }
  0x6a   : > { %s3795_s18 = scalar_lea.hbm %s4487_s9, %s3716_s29  ;;  %s3176_s21 = scalar_lea.hbm %s4487_s9, 32 }
  0x6b   : > { %s3171_s26 = scalar_lea.hbm %s3795_s18, 16  ;;  %p3177_p4 = scmp.lt.u32.totalorder %s3795_s18, %s4487_s9 }
  0x6c   : > { %p3172_p6 = scmp.ne.s32.totalorder %s3795_s18, %s3171_s26  ;;  %p3178_p5 = scmp.lt.u32.totalorder %s3176_s21, %s3171_s26 }
  0x6d   : > { %p3180_p9 = scmp.lt.u32.totalorder %s3171_s26, %s3795_s18 }
  0x6e   : > { %p3174_p0 = pnand %p3172_p6, %p3739_p8  ;;  %p3179_p7 = por %p3178_p5, %p3177_p4 }
  0x70   : > { %p3175_p3 = pneg %p3174_p0  ;;  %p3181_p11 = por %p3180_p9, %p3179_p7 }
  0x72   : > { %p3182_p12 = pnand %p3181_p11, %p3175_p3 }
  0x74   : > { %3185 = shalt.err (!%p3182_p12)
}
  0x75   : > { %s3186_s20 = scalar_lea.vmem %s749_s23, 16  ;;  %s3543_s17 = smov [#allocation12]  }
  0x76   : > { %p3187_p10 = scmp.ne.s32.totalorder %s749_s23, %s3186_s20  ;;  %s3191_s30 = sshll.u32 %s3543_s17, 4  ;;  %s3192_s30 = int_to_ptr.vmem [resolvable:$false] %s3191_s30 }
  0x77   : > { %s3193_s16 = scalar_lea.vmem %s3192_s30, 32  ;;  %p3194_p6 = scmp.lt.s32.totalorder %s749_s23, %s3192_s30 }
  0x78   : > { %p3189_p13 = pnand %p3187_p10, %p3739_p8  ;;  %p3195_p0 = scmp.lt.s32.totalorder %s3193_s16, %s3186_s20 }
  0x7a   : > { %p3190_p1 = pneg %p3189_p13  ;;  %p3196_p2 = por %p3195_p0, %p3194_p6 }
  0x7c   : > { %p3197_p4 = pnand %p3196_p2, %p3190_p1 }
  0x7e   : > { %3200 = shalt.err (!%p3197_p4)
}
  0x7f   : > { %p4488_p5 = scmp.ne.s32.totalorder %s4481_s27, 0  ;;  %s4489_s26 = scalar_lea.sflag [#allocation13], %s3710_s28 }
  0x80   : > { %s4490_s11 = sld [smem:[#allocation46_spill]]  ;;  %s779_s30 = scalar_lea.vmem [#allocation15], %s3713_s4 }
  0x81   : > { %2985 = dma.hbm_to_vmem [thread:$0]  (!%p4488_p5), %s3795_s18, 16, %s749_s23, %s4489_s26  }
  0x82   : > { %s786_s19 = sshll.u32 %s779_s30, 4  ;;  %s787_s19 = int_to_ptr.vmem [resolvable:$true] %s786_s19 }
  0x86   : > { %s3822_s5 = scalar_lea.hbm %s4490_s11, %s3716_s29  ;;  %s3206_s23 = scalar_lea.hbm %s4490_s11, 32 }
  0x87   : > { %s3201_s17 = scalar_lea.hbm %s3822_s5, 16  ;;  %p3207_p9 = scmp.lt.u32.totalorder %s3822_s5, %s4490_s11 }
  0x88   : > { %p3202_p2 = scmp.ne.s32.totalorder %s3822_s5, %s3201_s17  ;;  %p3208_p11 = scmp.lt.u32.totalorder %s3206_s23, %s3201_s17 }
  0x89   : > { %p3210_p10 = scmp.lt.u32.totalorder %s3201_s17, %s3822_s5 }
  0x8a   : > { %p3204_p3 = pnand %p3202_p2, %p3739_p8  ;;  %p3209_p12 = por %p3208_p11, %p3207_p9 }
  0x8c   : > { %p3205_p7 = pneg %p3204_p3  ;;  %p3211_p13 = por %p3210_p10, %p3209_p12 }
  0x8e   : > { %p3212_p1 = pnand %p3211_p13, %p3205_p7 }
  0x90   : > { %3215 = shalt.err (!%p3212_p1)
}
  0x91   : > { %s3216_s21 = scalar_lea.vmem %s787_s19, 16  ;;  %s3544_s30 = smov [#allocation15]  }
  0x92   : > { %p3217_p6 = scmp.ne.s32.totalorder %s787_s19, %s3216_s21  ;;  %s3221_s20 = sshll.u32 %s3544_s30, 4  ;;  %s3222_s20 = int_to_ptr.vmem [resolvable:$false] %s3221_s20 }
  0x93   : > { %s3223_s16 = scalar_lea.vmem %s3222_s20, 32  ;;  %p3224_p2 = scmp.lt.s32.totalorder %s787_s19, %s3222_s20 }
  0x94   : > { %p3219_p0 = pnand %p3217_p6, %p3739_p8  ;;  %p3225_p3 = scmp.lt.s32.totalorder %s3223_s16, %s3216_s21 }
  0x96   : > { %p3220_p4 = pneg %p3219_p0  ;;  %p3226_p5 = por %p3225_p3, %p3224_p2 }
  0x98   : > { %p3227_p9 = pnand %p3226_p5, %p3220_p4 }
  0x9a   : > { %3230 = shalt.err (!%p3227_p9)
}
  0x9b   : > { %p4491_p11 = scmp.ne.s32.totalorder %s4481_s27, 0  ;;  %s4492_s17 = scalar_lea.sflag [#allocation16], %s3710_s28 }
  0x9c   : > { %s4493_s13 = sld [smem:[#allocation47_spill]]  ;;  %s813_s20 = scalar_lea.vmem [#allocation18], %s3713_s4 }
  0x9d   : > { %2991 = dma.hbm_to_vmem [thread:$0]  (!%p4491_p11), %s3822_s5, 16, %s787_s19, %s4492_s17  }
  0x9e   : > { %s820_s3 = sshll.u32 %s813_s20, 4  ;;  %s821_s3 = int_to_ptr.vmem [resolvable:$true] %s820_s3 }
  0xa2   : > { %s3849_s26 = scalar_lea.hbm %s4493_s13, %s3716_s29  ;;  %s3236_s19 = scalar_lea.hbm %s4493_s13, 32 }
  0xa3   : > { %s3231_s30 = scalar_lea.hbm %s3849_s26, 16  ;;  %p3237_p10 = scmp.lt.u32.totalorder %s3849_s26, %s4493_s13 }
  0xa4   : > { %p3232_p5 = scmp.ne.s32.totalorder %s3849_s26, %s3231_s30  ;;  %p3238_p13 = scmp.lt.u32.totalorder %s3236_s19, %s3231_s30 }
  0xa5   : > { %p3240_p6 = scmp.lt.u32.totalorder %s3231_s30, %s3849_s26 }
  0xa6   : > { %p3234_p7 = pnand %p3232_p5, %p3739_p8  ;;  %p3239_p1 = por %p3238_p13, %p3237_p10 }
  0xa8   : > { %p3235_p12 = pneg %p3234_p7  ;;  %p3241_p0 = por %p3240_p6, %p3239_p1 }
  0xaa   : > { %p3242_p4 = pnand %p3241_p0, %p3235_p12 }
  0xac   : > { %3245 = shalt.err (!%p3242_p4)
}
  0xad   : > { %s3246_s23 = scalar_lea.vmem %s821_s3, 16  ;;  %s3545_s20 = smov [#allocation18]  }
  0xae   : > { %p3247_p2 = scmp.ne.s32.totalorder %s821_s3, %s3246_s23  ;;  %s3251_s21 = sshll.u32 %s3545_s20, 4  ;;  %s3252_s21 = int_to_ptr.vmem [resolvable:$false] %s3251_s21 }
  0xaf   : > { %s3253_s16 = scalar_lea.vmem %s3252_s21, 32  ;;  %p3254_p5 = scmp.lt.s32.totalorder %s821_s3, %s3252_s21 }
  0xb0   : > { %p3249_p3 = pnand %p3247_p2, %p3739_p8  ;;  %p3255_p7 = scmp.lt.s32.totalorder %s3253_s16, %s3246_s23 }
  0xb2   : > { %p3250_p9 = pneg %p3249_p3  ;;  %p3256_p11 = por %p3255_p7, %p3254_p5 }
  0xb4   : > { %p3257_p10 = pnand %p3256_p11, %p3250_p9 }
  0xb6   : > { %3260 = shalt.err (!%p3257_p10)
}
  0xb7   : > { %p4494_p13 = scmp.ne.s32.totalorder %s4481_s27, 0  ;;  %s4495_s30 = scalar_lea.sflag [#allocation19], %s3710_s28 }
  0xb8   : > { %s3873_s5 = sadd.s32 4294967295, %s3539_s25   ;;  %p204_p11 = scmp.ne.s32.totalorder %s3523_s22, %s3519_s1 }
  0xb9   : > { %2997 = dma.hbm_to_vmem [thread:$0]  (!%p4494_p13), %s3849_s26, 16, %s821_s3, %s4495_s30  }
  0xba   : > { %p4447_p12 = scmp.eq.s32.totalorder %s3873_s5, 0  ;;  %p2670_p1 = scmp.ge.s32.totalorder %s3539_s25, 1 }
  0xbb   : > { %p605_p6 = scmp.lt.s32.totalorder %s3539_s25, 3  ;;  %s3546_s26 = smov [#allocation3]  }
  0xbc   : > { %p3882_p0 = por %p4447_p12, %p204_p11  ;;  %s620_s3 = sshll.u32 %s3546_s26, 4  ;;  %s3890_s3 = int_to_ptr.vmem [resolvable:$true] %s620_s3 }
  0xbd   : > { %p3886_p4 = pnand %p2670_p1, %p605_p6  ;;  %s3895_s1 = sshll.u32 %s3713_s4, 4 }
  0xbe   : > { %s4496_s21 = scalar_select %p3882_p0, 1, 0 }
  0xbf   : > { %s4497_s19 = scalar_select %p3886_p4, 1, 0 }
  0xc0   : > { %p2966_p2 = pneg %p3886_p4  ;;  %s3898_s17 = sshll.u32 %s3535_s2, 8 }
  0xc1   : > { %s4499_s6 = sld [smem:[#allocation41_spill]]  ;;  %s683_s30 = scalar_lea.vmem [#allocation8], %s3895_s1 }
  0xc2   : > { %p3902_p3 = pnand %p2966_p2, %p4447_p12  ;;  %s690_s26 = sshll.u32 %s683_s30, 4  ;;  %s3913_s26 = int_to_ptr.vmem [resolvable:$true] %s690_s26 }
  0xc3   : > { %s4500_s11 = sld [smem:[#allocation35_spill]] }
  0xc4   : > { %p3263_p5 = pneg %p3902_p3 }
  0xc7   : > { %s3910_s16 = scalar_lea.hbm %s4499_s6, %s3898_s17 }
  0xc9   : > { %s3261_s13 = scalar_lea.hbm %s4500_s11, 256 }
  0xca   : > { %p3262_p9 = scmp.ne.s32.totalorder %s4500_s11, %s3261_s13  ;;  %p3268_p11 = scmp.lt.u32.totalorder %s3261_s13, %s4500_s11 }
  0xcc   : > { %p3264_p7 = pnand %p3263_p5, %p3262_p9 }
  0xce   : > { %p3265_p10 = pneg %p3264_p7 }
  0xd0   : > { %p3270_p1 = pnand %p3268_p11, %p3265_p10 }
  0xd2   : > { %3273 = shalt.err (!%p3270_p1)
}
  0xd3   : > { %s3274_s30 = scalar_lea.vmem %s3890_s3, 256  ;;  %p3282_p0 = scmp.lt.s32.totalorder %s3890_s3, %s3890_s3 }
  0xd4   : > { %p3275_p6 = scmp.ne.s32.totalorder %s3890_s3, %s3274_s30  ;;  %p3283_p4 = scmp.lt.s32.totalorder %s3274_s30, %s3274_s30 }
  0xd6   : > { %p3277_p2 = pnand %p3275_p6, %p3263_p5  ;;  %p3284_p13 = por %p3283_p4, %p3282_p0 }
  0xd8   : > { %p3278_p12 = pneg %p3277_p2 }
  0xda   : > { %p3285_p8 = pnand %p3284_p13, %p3278_p12 }
  0xdc   : > { %3288 = shalt.err (!%p3285_p8)
}
  0xdd   : > { %s3547_s7 = smov 128   ;;  %s3548_s9 = smov 8  }
  0xde   : > { %2969 = dma.hbm_to_vmem [thread:$0]  (!%p3902_p3), %s4500_s11, 256, %s3890_s3, [#allocation4], %s3547_s7, %s3547_s7, %s3548_s9  }
  0xdf   : > { %s3289_s25 = scalar_lea.hbm %s3910_s16, 256  ;;  %p4501_p5 = scmp.ne.s32.totalorder %s4482_s0, 0 }
  0xe0   : > { %p3290_p9 = scmp.ne.s32.totalorder %s3910_s16, %s3289_s25  ;;  %s3294_s30 = scalar_lea.hbm %s4499_s6, 512 }
  0xe1   : > { %p3295_p8 = scmp.lt.u32.totalorder %s3910_s16, %s4499_s6  ;;  %p3296_p12 = scmp.lt.u32.totalorder %s3294_s30, %s3289_s25 }
  0xe2   : > { %p3292_p0 = pnand %p3290_p9, %p4501_p5  ;;  %p3298_p7 = scmp.lt.u32.totalorder %s3289_s25, %s3910_s16 }
  0xe3   : > { %p3297_p4 = por %p3296_p12, %p3295_p8 }
  0xe4   : > { %p3293_p13 = pneg %p3292_p0 }
  0xe5   : > { %p3299_p10 = por %p3298_p7, %p3297_p4 }
  0xe7   : > { %p3300_p11 = pnand %p3299_p10, %p3293_p13 }
  0xe9   : > { %3303 = shalt.err (!%p3300_p11)
}
  0xea   : > { %s3304_s3 = scalar_lea.vmem %s3913_s26, 256  ;;  %s3549_s18 = smov [#allocation8]  }
  0xeb   : > { %p3305_p3 = scmp.ne.s32.totalorder %s3913_s26, %s3304_s3  ;;  %s3309_s7 = sshll.u32 %s3549_s18, 4  ;;  %s3310_s7 = int_to_ptr.vmem [resolvable:$false] %s3309_s7 }
  0xec   : > { %s3311_s14 = scalar_lea.vmem %s3310_s7, 512  ;;  %p3312_p2 = scmp.lt.s32.totalorder %s3913_s26, %s3310_s7 }
  0xed   : > { %p3307_p1 = pnand %p3305_p3, %p4501_p5  ;;  %p3313_p9 = scmp.lt.s32.totalorder %s3311_s14, %s3304_s3 }
  0xef   : > { %p3308_p6 = pneg %p3307_p1  ;;  %p3314_p0 = por %p3313_p9, %p3312_p2 }
  0xf1   : > { %p3315_p8 = pnand %p3314_p0, %p3308_p6 }
  0xf3   : > { %3318 = shalt.err (!%p3315_p8)
}
  0xf4   : > { %s3550_s24 = smov 64   ;;  %s3551_s9 = smov 4  }
  0xf5   : > { %p4502_p13 = scmp.ne.s32.totalorder %s4481_s27, 0  ;;  %s4503_s13 = scalar_lea.sflag [#allocation7], %s3710_s28 }
  0xf6   : > { %s4504_s8 = sld [smem:[#allocation43_spill]]  ;;  %s721_s20 = scalar_lea.vmem [#allocation11], %s3895_s1 }
  0xf7   : > { %2976 = dma.hbm_to_vmem [thread:$0]  (!%p4502_p13), %s3910_s16, 256, %s3913_s26, %s4503_s13, %s3550_s24, %s3550_s24, %s3551_s9  }
  0xf8   : > { %s728_s30 = sshll.u32 %s721_s20, 4  ;;  %s4505_s10 = sld [smem:[#allocation45_spill]]  ;;  %s3969_s30 = int_to_ptr.vmem [resolvable:$true] %s728_s30 }
  0xfc   : > { %s3966_s23 = scalar_lea.hbm %s4504_s8, %s3898_s17  ;;  %s3324_s13 = scalar_lea.hbm %s4504_s8, 512 }
  0xfd   : > { %s3319_s14 = scalar_lea.hbm %s3966_s23, 256  ;;  %p3325_p10 = scmp.lt.u32.totalorder %s3966_s23, %s4504_s8 }
  0xfe   : > { %s3975_s7 = scalar_lea.hbm %s4505_s10, %s3898_s17  ;;  %p3320_p12 = scmp.ne.s32.totalorder %s3966_s23, %s3319_s14 }
  0xff   : > { %p3326_p11 = scmp.lt.u32.totalorder %s3324_s13, %s3319_s14  ;;  %p3328_p1 = scmp.lt.u32.totalorder %s3319_s14, %s3966_s23 }
 0x100   : > { %p3322_p4 = pnand %p3320_p12, %p4501_p5 }
 0x101   : > { %p3327_p3 = por %p3326_p11, %p3325_p10 }
 0x102   : > { %p3323_p7 = pneg %p3322_p4 }
 0x103   : > { %p3329_p6 = por %p3328_p1, %p3327_p3 }
 0x105   : > { %p3330_p2 = pnand %p3329_p6, %p3323_p7 }
 0x107   : > { %3333 = shalt.err (!%p3330_p2)
}
 0x108   : > { %s3334_s17 = scalar_lea.vmem %s3969_s30, 256  ;;  %s3552_s20 = smov [#allocation11]  }
 0x109   : > { %p3335_p9 = scmp.ne.s32.totalorder %s3969_s30, %s3334_s17  ;;  %s3339_s3 = sshll.u32 %s3552_s20, 4  ;;  %s3340_s3 = int_to_ptr.vmem [resolvable:$false] %s3339_s3 }
 0x10a   : > { %s3341_s18 = scalar_lea.vmem %s3340_s3, 512  ;;  %p3342_p12 = scmp.lt.s32.totalorder %s3969_s30, %s3340_s3 }
 0x10b   : > { %p3337_p0 = pnand %p3335_p9, %p4501_p5  ;;  %p3343_p4 = scmp.lt.s32.totalorder %s3341_s18, %s3334_s17 }
 0x10d   : > { %p3338_p8 = pneg %p3337_p0  ;;  %p3344_p10 = por %p3343_p4, %p3342_p12 }
 0x10f   : > { %p3345_p11 = pnand %p3344_p10, %p3338_p8 }
 0x111   : > { %3348 = shalt.err (!%p3345_p11)
}
 0x112   : > { %s4506_s14 = scalar_lea.sflag [#allocation10], %s3710_s28  ;;  %s759_s16 = scalar_lea.vmem [#allocation14], %s3895_s1 }
 0x113   : > { %2982 = dma.hbm_to_vmem [thread:$0]  (!%p4502_p13), %s3966_s23, 256, %s3969_s30, %s4506_s14, %s3550_s24, %s3550_s24, %s3551_s9  }
 0x114   : > { %s766_s26 = sshll.u32 %s759_s16, 4  ;;  %s4010_s25 = scalar_lea.hbm %s4428_s12, %s3716_s29  ;;  %s4004_s26 = int_to_ptr.vmem [resolvable:$true] %s766_s26 }
 0x115   : > { %s3349_s17 = scalar_lea.hbm %s3975_s7, 256  ;;  %s3354_s18 = scalar_lea.hbm %s4505_s10, 512 }
 0x116   : > { %p3350_p7 = scmp.ne.s32.totalorder %s3975_s7, %s3349_s17  ;;  %p3355_p6 = scmp.lt.u32.totalorder %s3975_s7, %s4505_s10 }
 0x117   : > { %p3356_p2 = scmp.lt.u32.totalorder %s3354_s18, %s3349_s17  ;;  %p3358_p0 = scmp.lt.u32.totalorder %s3349_s17, %s3975_s7 }
 0x118   : > { %p3352_p3 = pnand %p3350_p7, %p4501_p5 }
 0x119   : > { %p3357_p9 = por %p3356_p2, %p3355_p6 }
 0x11a   : > { %p3353_p1 = pneg %p3352_p3 }
 0x11b   : > { %p3359_p8 = por %p3358_p0, %p3357_p9 }
 0x11d   : > { %p3360_p12 = pnand %p3359_p8, %p3353_p1 }
 0x11f   : > { %3363 = shalt.err (!%p3360_p12)
}
 0x120   : > { %s3364_s1 = scalar_lea.vmem %s4004_s26, 256  ;;  %s3553_s30 = smov [#allocation14]  }
 0x121   : > { %p3365_p4 = scmp.ne.s32.totalorder %s4004_s26, %s3364_s1  ;;  %s3369_s14 = sshll.u32 %s3553_s30, 4  ;;  %s3370_s14 = int_to_ptr.vmem [resolvable:$false] %s3369_s14 }
 0x122   : > { %s3371_s6 = scalar_lea.vmem %s3370_s14, 512  ;;  %p3372_p7 = scmp.lt.s32.totalorder %s4004_s26, %s3370_s14 }
 0x123   : > { %p3367_p10 = pnand %p3365_p4, %p4501_p5  ;;  %p3373_p3 = scmp.lt.s32.totalorder %s3371_s6, %s3364_s1 }
 0x125   : > { %p3368_p11 = pneg %p3367_p10  ;;  %p3374_p6 = por %p3373_p3, %p3372_p7 }
 0x127   : > { %p3375_p2 = pnand %p3374_p6, %p3368_p11 }
 0x129   : > { %3378 = shalt.err (!%p3375_p2)
}
 0x12a   : > { %s4507_s16 = scalar_lea.sflag [#allocation13], %s3710_s28  ;;  %s796_s13 = scalar_lea.vmem [#allocation17], %s3713_s4 }
 0x12b   : > { %2988 = dma.hbm_to_vmem [thread:$0]  (!%p4502_p13), %s3975_s7, 256, %s4004_s26, %s4507_s16, %s3550_s24, %s3550_s24, %s3551_s9  }
 0x12c   : > { %s803_s2 = sshll.u32 %s796_s13, 4  ;;  %s4043_s3 = scalar_lea.hbm %s4431_s15, %s3716_s29  ;;  %s804_s2 = int_to_ptr.vmem [resolvable:$true] %s803_s2 }
 0x12d   : > { %s3379_s18 = scalar_lea.hbm %s4010_s25, 16  ;;  %s3384_s30 = scalar_lea.hbm %s4428_s12, 32 }
 0x12e   : > { %p3380_p1 = scmp.ne.s32.totalorder %s4010_s25, %s3379_s18  ;;  %p3385_p8 = scmp.lt.u32.totalorder %s4010_s25, %s4428_s12 }
 0x12f   : > { %p3386_p12 = scmp.lt.u32.totalorder %s3384_s30, %s3379_s18  ;;  %p3388_p10 = scmp.lt.u32.totalorder %s3379_s18, %s4010_s25 }
 0x130   : > { %p3382_p9 = pnand %p3380_p1, %p4501_p5 }
 0x131   : > { %p3387_p4 = por %p3386_p12, %p3385_p8 }
 0x132   : > { %p3383_p0 = pneg %p3382_p9 }
 0x133   : > { %p3389_p11 = por %p3388_p10, %p3387_p4 }
 0x135   : > { %p3390_p7 = pnand %p3389_p11, %p3383_p0 }
 0x137   : > { %3393 = shalt.err (!%p3390_p7)
}
 0x138   : > { %s3394_s29 = scalar_lea.vmem %s804_s2, 16  ;;  %s3554_s24 = smov [#allocation17]  }
 0x139   : > { %p3395_p3 = scmp.ne.s32.totalorder %s804_s2, %s3394_s29  ;;  %s3399_s9 = sshll.u32 %s3554_s24, 4  ;;  %s3400_s9 = int_to_ptr.vmem [resolvable:$false] %s3399_s9 }
 0x13a   : > { %s3401_s7 = scalar_lea.vmem %s3400_s9, 32  ;;  %p3402_p1 = scmp.lt.s32.totalorder %s804_s2, %s3400_s9 }
 0x13b   : > { %p3397_p6 = pnand %p3395_p3, %p4501_p5  ;;  %p3403_p9 = scmp.lt.s32.totalorder %s3401_s7, %s3394_s29 }
 0x13d   : > { %p3398_p2 = pneg %p3397_p6  ;;  %p3404_p13 = por %p3403_p9, %p3402_p1 }
 0x13f   : > { %p3405_p8 = pnand %p3404_p13, %p3398_p2 }
 0x141   : > { %3408 = shalt.err (!%p3405_p8)
}
 0x142   : > { %p4508_p12 = scmp.ne.s32.totalorder %s4481_s27, 0  ;;  %s4509_s26 = scalar_lea.sflag [#allocation16], %s3710_s28 }
 0x143   : > { %s838_s16 = scalar_lea.vmem [#allocation20], %s3713_s4  ;;  %s3409_s17 = scalar_lea.hbm %s4043_s3, 16 }
 0x144   : > { %2994 = dma.hbm_to_vmem [thread:$0]  (!%p4508_p12), %s4010_s25, 16, %s804_s2, %s4509_s26  }
 0x145   : > { %s845_s13 = sshll.u32 %s838_s16, 4  ;;  %p3410_p0 = scmp.ne.s32.totalorder %s4043_s3, %s3409_s17  ;;  %s846_s13 = int_to_ptr.vmem [resolvable:$true] %s845_s13 }
 0x146   : > { %s3414_s23 = scalar_lea.hbm %s4431_s15, 32  ;;  %p3415_p10 = scmp.lt.u32.totalorder %s4043_s3, %s4431_s15 }
 0x147   : > { %p3412_p13 = pnand %p3410_p0, %p4501_p5  ;;  %p3416_p11 = scmp.lt.u32.totalorder %s3414_s23, %s3409_s17 }
 0x148   : > { %p3418_p3 = scmp.lt.u32.totalorder %s3409_s17, %s4043_s3 }
 0x149   : > { %p3413_p4 = pneg %p3412_p13  ;;  %p3417_p7 = por %p3416_p11, %p3415_p10 }
 0x14b   : > { %p3419_p6 = por %p3418_p3, %p3417_p7 }
 0x14d   : > { %p3420_p2 = pnand %p3419_p6, %p3413_p4 }
 0x14f   : > { %3423 = shalt.err (!%p3420_p2)
}
 0x150   : > { %s3424_s4 = scalar_lea.vmem %s846_s13, 16  ;;  %s3555_s25 = smov [#allocation20]  }
 0x151   : > { %p3425_p1 = scmp.ne.s32.totalorder %s846_s13, %s3424_s4  ;;  %s3429_s2 = sshll.u32 %s3555_s25, 4  ;;  %s3430_s2 = int_to_ptr.vmem [resolvable:$false] %s3429_s2 }
 0x152   : > { %s3431_s14 = scalar_lea.vmem %s3430_s2, 32  ;;  %p3432_p0 = scmp.lt.s32.totalorder %s846_s13, %s3430_s2 }
 0x153   : > { %p3427_p9 = pnand %p3425_p1, %p4501_p5  ;;  %p3433_p13 = scmp.lt.s32.totalorder %s3431_s14, %s3424_s4 }
 0x155   : > { %p3428_p8 = pneg %p3427_p9  ;;  %p3434_p12 = por %p3433_p13, %p3432_p0 }
 0x157   : > { %p3435_p10 = pnand %p3434_p12, %p3428_p8 }
 0x159   : > { %3438 = shalt.err (!%p3435_p10)
}
 0x15a   : > { %p4510_p11 = scmp.ne.s32.totalorder %s4481_s27, 0  ;;  %s4511_s6 = scalar_lea.sflag [#allocation19], %s3710_s28 }
 0x15b   : > { %p4512_p4 = scmp.ne.s32.totalorder %s4497_s19, 0 }
 0x15c   : > { %3000 = dma.hbm_to_vmem [thread:$0]  (!%p4510_p11), %s4043_s3, 16, %s846_s13, %s4511_s6  }
 0x15d   : > { %880 = sbr.rel (%p4512_p4) target bundleno = 3251 (0xcb3), region = 100  ;;  %p4513_p5 = scmp.eq.s32.totalorder (!%p4512_p4), %s3873_s5, 0 }
 0x164   : > { %3490 = dma.done.wait (%p4513_p5), [#allocation4], 256   ;;  %p4514_p7 = pmov %p4513_p5 }
 0x165   : > { %s886_s0 = sand.u32 1, %s3873_s5   ;;  %s4092_s29 = sand.u32 1, %s3523_s22  }
 0x166   : > { %3492 = vsyncadd (%p4514_p7), [#allocation4], 4294967040  ;;  %s887_s27 = scalar_lea.sflag [#allocation7], %s886_s0  ;;  %p4515_p12 = scmp.ne.s32.totalorder %s4496_s21, 0 }
 0x168   : > { %3494 = dma.done.wait (%p4515_p12), %s887_s27, 272  }
 0x169   : > { %3496 = vsyncadd (%p4515_p12), %s887_s27, 4294967024  ;;  %s4100_s19 = sshll.u32 %s4092_s29, 4  ;;  %s904_s24 = scalar_lea.sflag [#allocation10], %s886_s0 }
 0x16a   : > { %3498 = dma.done.wait (%p4515_p12), %s904_s24, 272  }
 0x16b   : > { %3500 = vsyncadd (%p4515_p12), %s904_s24, 4294967024  ;;  %s921_s26 = scalar_lea.sflag [#allocation13], %s886_s0 }
 0x16c   : > { %3502 = dma.done.wait (%p4515_p12), %s921_s26, 272  }
 0x16d   : > { %3504 = vsyncadd (%p4515_p12), %s921_s26, 4294967024  ;;  %s938_s17 = scalar_lea.sflag [#allocation16], %s886_s0 }
 0x16e   : > { %3506 = dma.done.wait (%p4515_p12), %s938_s17, 32  }
 0x16f   : > { %3508 = vsyncadd (%p4515_p12), %s938_s17, 4294967264  ;;  %s954_s23 = scalar_lea.sflag [#allocation19], %s886_s0 }
 0x170   : > { %3510 = dma.done.wait (%p4515_p12), %s954_s23, 32  }
 0x171   : > { %3512 = vsyncadd (%p4515_p12), %s954_s23, 4294967264  ;;  %s4516_s30 = sld [smem:[#allocation30_spill]]  ;;  %s4517_s0 = sld [smem:[#allocation39_spill]] }
 0x172   : > { %s4518_s17 = sld [smem:[#allocation48_spill]]  ;;  %s4519_s20 = sld [smem:[#allocation49_spill]] }
 0x173   : > { %s4520_s9 = sld [smem:[#allocation50_spill]]  ;;  %s4521_s14 = sld [smem:[#allocation51_spill]] }
 0x174   : > { %s4522_s10 = sld [smem:[#allocation52_spill]]  ;;  %s964_s24 = scalar_lea.vmem [#allocation20], %s4092_s29 }
 0x177   : > { %p1099_p3 = scmp.lt.s32.totalorder %s4516_s30, 1  ;;  %p2701_p6 = scmp.ne.s32.totalorder %s4516_s30, 0 }
 0x178   : > { %v1129_v0 = vld [vmem:[#allocation3] sm:$0xff] (!%p2701_p6)  ;;  %s4523_s1 = sld [smem:[#allocation36_spill]] (!%p2701_p6)  ;;  %vm1134_vm0 = vcmask (!%p2701_p6), 261120   ;;  %v1130_v2 = vld [vmem:[#allocation3 + $0x8] sm:$0xff] (!%p2701_p6)  ;;  %vm1137_vm1 = vcmask (!%p2701_p6), 253952   ;;  %v3556_v5 = vmov (!%p2701_p6), 0.0  }
 0x179   : > { %s4128_s4 = scalar_select %p1099_p3, %s4516_s30, 1 }
 0x17a   : > { %1128 = sbr.rel (%p2701_p6) target bundleno = 386 (0x182), region = 148  ;;  %1138 = vst.msk [vmem:[#allocation2] sm:$0x1] (!%p2701_p6), %vm1137_vm1, %v3556_v5  ;;  %1139 = vst.msk [vmem:[#allocation2 + $0x10] sm:$0x1] (!%p2701_p6), %vm1137_vm1, %v3556_v5 }
 0x17b   : > { %s2762_s25 = sshll.u32 %s4128_s4, 4  ;;  %s2937_s2 = smul.u32 48, %s4128_s4  ;;  %1140 = vst.msk [vmem:[#allocation2 + $0x9] sm:$0x1] (!%p2701_p6), %vm1137_vm1, %v3556_v5  ;;  %1141 = vst.msk [vmem:[#allocation2 + $0x19] sm:$0x1] (!%p2701_p6), %vm1137_vm1, %v3556_v5 }
 0x17c   : > { %s4135_s27 = scalar_lea.vmem %s4517_s0, %s2762_s25  ;;  %s2763_s21 = sshll.u32 %s4128_s4, 5 }
 0x17d   : > { %s4141_s23 = scalar_lea.vmem %s4518_s17, %s2937_s2  ;;  %s4146_s13 = scalar_lea.vmem %s4519_s20, %s2763_s21 }
 0x17e   : > { %s1116_s7 = scalar_lea.vmem %s4520_s9, %s4128_s4  ;;  %s1119_s25 = scalar_lea.vmem %s4521_s14, %s4128_s4  ;;  %v1131_v1 = vld [vmem:[%s4523_s1] sm:$0xff] (!%p2701_p6) }
 0x17f   : > { %s1122_s11 = scalar_lea.vmem %s4522_s10, %s4128_s4  ;;  %v1132_v3 = vadd.f32 (!%p2701_p6), %v1131_v1, %v1129_v0  ;;  %v1133_v4 = vadd.f32 (!%p2701_p6), %v1131_v1, %v1130_v2 }
 0x181   : > { %1135 = vst.msk [vmem:[#allocation21] sm:$0xff] %vm1134_vm0, %v1132_v3  ;;  %1136 = vst.msk [vmem:[#allocation21 + $0x8] sm:$0xff] %vm1134_vm0, %v1133_v4 }
 0x182 PF: > { %s4524_s8 = scalar_lea.vmem [#allocation8], %s4100_s19  ;;  %v3557_v7 = vmov 0.0   ;;  %v3070_v8 = vld [vmem:[%s4135_s27] sm:$0xff]   ;;  %vm3558_vm2 = vmmov 0   ;;  %v3072_v12 = vld [vmem:[%s4135_s27 + $0x8] sm:$0xff]   ;;  %vm1176_vm3 = vcmask 261120   ;;  %v1359_v49 = vlaneseq }
 0x183   : > { %v3069_v6 = vld [vmem:[%s4524_s8] sm:$0xff]   ;;  %2815 = vmatprep.subr.bf16.mxu1 %v3557_v7  ;;  %2807 = vmatprep.subr.bf16.mxu0 %v3557_v7  ;;  %s4525_s10 = smov %s4524_s8  ;;  %s4526_s28 = scalar_lea.vmem [#allocation11], %s4100_s19  ;;  %vm1369_vm4 = vcmask 130048   ;;  %vm1490_vm5 = vcmask 1043456   ;;  %vm1462_vm6 = vcmask 64512   ;;  %vm2226_vm7 = vcmask 523264  }
 0x184   : > { %2816 = vmatpush3.bf16.msra.mxu1 %v3069_v6  ;;  %v3071_v9 = vld [vmem:[%s4525_s10 + $0x8] sm:$0xff]   ;;  %2819 = vmatprep.mubr.msk.bf16.mxu1 %vm3558_vm2, %v3557_v7  ;;  %s4527_s3 = smov %s4526_s28  ;;  %s4528_s9 = scalar_lea.vmem [#allocation9], %s4092_s29  ;;  %v1360_v50 = vshrl.u32 %v1359_v49, 7 }
 0x185   : > { %2817 = vmatprep.subr.bf16.mxu1 %v3557_v7  ;;  %2808 = vmatpush3.bf16.msra.mxu0 %v3070_v8  ;;  %v3073_v14 = vld [vmem:[%s4526_s28] sm:$0xff]   ;;  %v2706_v16 = vld [vmem:[%s4528_s9] ss:$0 sm:$0xff]  ;;  %s4529_s16 = scalar_lea.vmem [#allocation6], %s4092_s29  ;;  %s3559_s30 = smov 112  }
 0x186   : > { %2809 = vmatprep.subr.bf16.mxu0 %v3557_v7  ;;  %2811 = vmatprep.mubr.msk.bf16.mxu0 %vm3558_vm2, %v3557_v7  ;;  %v3074_v15 = vld [vmem:[%s4527_s3 + $0x8] sm:$0xff]   ;;  %v2702_v17 = vld [vmem:[%s4529_s16] ss:$0 sm:$0xff]  ;;  %s4530_s2 = scalar_lea.vmem [#allocation12], %s4092_s29  ;;  %s4531_s26 = sld [smem:[#allocation38_spill]]  ;;  %v1361_v54 = vsub.s32 0, %v1360_v50 }
 0x187   : > { %v2710_v35 = vld [vmem:[%s4530_s2] ss:$0 sm:$0xff]  ;;  %s4532_s6 = scalar_lea.vmem [#allocation14], %s4100_s19  ;;  %s4534_s19 = scalar_lea.vmem [#allocation15], %s4092_s29 }
 0x188   : > { %v4175_v10 = vld [vmem:[#allocation21] sm:$0xff]  ;;  %v4177_v11 = vld [vmem:[#allocation21 + $0x8] sm:$0xff]  ;;  %2818 = vmatpush3.bf16.msra.mxu1 %v3071_v9  ;;  %s4533_s0 = smov %s4532_s6  ;;  %s4535_s1 = sld [smem:[#allocation37_spill]] }
 0x189   : > { %v1144_v13 = vpack.c.bf16 %v4177_v11, %v4175_v10  ;;  %2810 = vmatpush3.bf16.msra.mxu0 %v3072_v12  ;;  %2831 = vmatprep.subr.bf16.mxu1 %v3557_v7  ;;  %s4537_s3 = scalar_lea.vmem [#allocation17], %s4092_s29  ;;  %s4538_s9 = scalar_lea.vmem [#allocation18], %s4092_s29 }
 0x18a   : > { %2823 = vmatprep.subr.bf16.mxu0 %v3557_v7  ;;  %s3561_s21 = smov [#allocation21]   ;;  %p3004_p2 = scmp.eq.s32.totalorder %s3873_s5, 1 }
 0x18b   : > { %2820 = vmatmul.mubr.msk.bf16.vlgmr.msra.gmra.mrb[0].mxu1 %vm1176_vm3, %v1144_v13  ;;  %s2330_s17 = sshll.u32 %s3561_s21, 4  ;;  %s2331_s17 = int_to_ptr.vmem [resolvable:$true] %s2330_s17 }
 0x18c   : > { %2812 = vmatmul.mubr.msk.bf16.vlgmr.msra.gmra.mrb[0].mxu0 %vm1176_vm3, %v1144_v13  ;;  %2833 = vmatprep.mubr.msk.bf16.mxu1 %vm3558_vm2, %v3557_v7  ;;  %v1149_v51 = vld [vmem:[%s4531_s26] sm:$0x1]  ;;  %v1150_v52 = vld [vmem:[%s4531_s26 + $0x1] sm:$0x1]  ;;  %p3446_p0 = scmp.lt.s32.totalorder %s2331_s17, %s2331_s17 }
 0x18d   : > { %2824 = vmatpush3.bf16.msra.mxu0 %v3073_v14  ;;  %2827 = vmatprep.mubr.msk.bf16.mxu0 %vm3558_vm2, %v3557_v7  ;;  %v1151_v53 = vmul.f32 -1e+09, %v1149_v51  ;;  %v1152_v55 = vmul.f32 -1e+09, %v1150_v52 }
 0x18e   : > { %2825 = vmatprep.subr.bf16.mxu0 %v3557_v7  ;;  %s4536_s8 = smov %s4535_s1 }
 0x18f   : > { %v4235_v56 = vrot.slane %v1151_v53, %v1361_v54  ;;  %v4237_v57 = vrot.slane %v1152_v55, %v1361_v54 }
 0x191   : > { %2826 = vmatpush3.bf16.msra.mxu0 %v3074_v15 }
 0x192   : > { %2837 = vmatprep.subr.bf16.mxu0 %v3557_v7 }
 0x194   : > { %2828 = vmatmul.mubr.msk.bf16.vlgmr.msra.gmra.mrb[4].mxu0 %vm1176_vm3, %v1144_v13 }
 0x195   : > { %2839 = vmatprep.mubr.msk.bf16.mxu0 %vm3558_vm2, %v3557_v7 }
 0x25e   : > { %v1280_v18 = vpop.f32.mrb[0].mxu1 }
 0x25f   : > { %v1281_v19 = vadd.f32 %v2706_v16, %v1280_v18  ;;  %v2821_v20 = vpop.f32.mrb[1].mxu1  ;;  %v1214_v21 = vpop.f32.mrb[0].mxu0 }
 0x260   : > { %v1283_v22 = vpop.f32.mrb[2].mxu1  ;;  %v1215_v23 = vadd.f32 %v2702_v17, %v1214_v21  ;;  %v2813_v24 = vpop.f32.mrb[1].mxu0 }
 0x261   : > { %v1353_v25 = vpack.c.bf16 %v1281_v19, %v1281_v19  ;;  %v1284_v26 = vadd.f32 %v2706_v16, %v1283_v22  ;;  %v2822_v27 = vpop.f32.mrb[3].mxu1  ;;  %v1217_v28 = vpop.f32.mrb[2].mxu0 }
 0x262   : > { %v2814_v29 = vpop.f32.mrb[3].mxu0  ;;  %v1221_v32 = vmul.f32 0.25, %v1215_v23  ;;  %v1218_v33 = vadd.f32 %v2702_v17, %v1217_v28 }
 0x263   : > { %v1374_v30 = vsel %vm1369_vm4, %v1353_v25, 0  ;;  %v1354_v31 = vpack.c.bf16 %v1284_v26, %v1284_v26 }
 0x264   : > { %2832 = vmatpush3.bf16.xpose.msra.mxu1 %v1374_v30  ;;  %v1351_v36 = vpack.c.bf16 %v1221_v32, %v1221_v32  ;;  %v1222_v37 = vmul.f32 0.25, %v1218_v33 }
 0x265   : > { %v1420_v34 = vsel %vm1369_vm4, %v1354_v31, 0  ;;  %1639 = vrot.lane.b32.xlu1 %v1354_v31, %s3559_s30  ;;  %2843 = vmatprep.subr.bf16.mxu1 %v3557_v7 }
 0x266   : > { %2838 = vmatpush3.bf16.xpose.msra.mxu0 %v1420_v34  ;;  %v1352_v45 = vpack.c.bf16 %v1222_v37, %v1222_v37 }
 0x267   : > { %v1344_v38 = vpop.f32.mrb[4].mxu0  ;;  %2849 = vmatprep.subr.bf16.mxu0 %v3557_v7 }
 0x268   : > { %v1345_v39 = vadd.f32 %v2710_v35, %v1344_v38  ;;  %v2829_v40 = vpop.f32.mrb[5].mxu0 }
 0x269   : > { %v1347_v41 = vpop.f32.mrb[6].mxu0 }
 0x26a   : > { %v4213_v42 = vpack.c.bf16 %v1345_v39, %v1345_v39  ;;  %v1348_v43 = vadd.f32 %v2710_v35, %v1347_v41  ;;  %v2830_v44 = vpop.f32.mrb[7].mxu0 }
 0x26b   : > { %2834 = vmatmul.mubr.msk.bf16.vlgmr.msra.gmra.mrb[4].mxu1 %vm1369_vm4, %v1351_v36 }
 0x26c   : > { %v1492_v46 = vsel %vm1490_vm5, %v4213_v42, 0  ;;  %v4218_v47 = vpack.c.bf16 %v1348_v43, %v1348_v43  ;;  %2845 = vmatprep.mubr.msk.bf16.mxu1 %vm3558_vm2, %v3557_v7 }
 0x26d   : > { %2840 = vmatmul.mubr.msk.bf16.vlgmr.msra.gmra.mrb[8].mxu0 %vm1369_vm4, %v1352_v45  ;;  %2844 = vmatpush3.bf16.msra.mxu1 %v1492_v46 }
 0x26e   : > { %v1538_v48 = vsel %vm1490_vm5, %v4218_v47, 0  ;;  %2855 = vmatprep.subr.bf16.mxu1 %v3557_v7  ;;  %2851 = vmatprep.mubr.msk.bf16.mxu0 %vm3558_vm2, %v3557_v7 }
 0x26f   : > { %2850 = vmatpush3.bf16.msra.mxu0 %v1538_v48 }
 0x270   : > { %2861 = vmatprep.subr.bf16.mxu0 %v3557_v7 }
 0x2d7   : > { %v1640_v19 = vpop.permute.xlu1 %1639 }
 0x2d8   : > { %v1645_v30 = vsel %vm1369_vm4, %v1640_v19, 0 }
 0x33e   : > { %v1410_v58 = vpop.f32.mrb[4].mxu1 }
 0x33f   : > { %v1411_v59 = vadd.f32 %v1410_v58, %v4235_v56  ;;  %v2835_v60 = vpop.f32.mrb[5].mxu1 }
 0x340   : > { %v1413_v61 = vpop.f32.mrb[6].mxu1  ;;  %v1456_v62 = vpop.f32.mrb[8].mxu0 }
 0x341   : > { %v1457_v63 = vadd.f32 %v1456_v62, %v4237_v57  ;;  %v2836_v0 = vpop.f32.mrb[7].mxu1  ;;  %v2841_v1 = vpop.f32.mrb[9].mxu0  ;;  %v1463_v2 = vsel %vm1462_vm6, %v1411_v59, -inf }
 0x342   : > { %1464 = vmax.xlane.f32.xlu0 %v1463_v2  ;;  %v1459_v3 = vpop.f32.mrb[10].mxu0 }
 0x343   : > { %v2842_v4 = vpop.f32.mrb[11].mxu0  ;;  %v1466_v5 = vsel %vm1462_vm6, %v1457_v63, -inf }
 0x346   : > { %1467 = vmax.xlane.f32.xlu0 %v1466_v5 }
 0x35c   : > { %1587 = vrot.lane.b32.xlu0 %v1353_v25, %s3559_s30 }
 0x3cf   : > { %v1465_v6 = vpop.xlane.xlu0 %1464 }
 0x3d0   : > { %v1469_v8 = vsub.f32 %v1411_v59, %v1465_v6 }
 0x3d2   : > { %v1471_v9 = vmul.f32 1.442695, %v1469_v8 }
 0x3d3   : > { %v1468_v12 = vpop.xlane.xlu0 %1467 }
 0x3d4   : > { %3087 = vpow2.f32 %v1471_v9  ;;  %v1470_v13 = vsub.f32 %v1457_v63, %v1468_v12 }
 0x3d6   : > { %v1473_v14 = vmul.f32 1.442695, %v1470_v13 }
 0x3d7   : > { %v1588_v24 = vpop.permute.xlu0 %1587 }
 0x3d8   : > { %3089 = vpow2.f32 %v1473_v14  ;;  %v1593_v27 = vsel %vm1369_vm4, %v1588_v24, 0 }
 0x3de   : > { %v3088_v15 = vpop.eup %3087 }
 0x3df   : > { %v1475_v16 = vsel %vm1462_vm6, %v3088_v15, 0.0 }
 0x3e0   : > { %1476 = vadd.xlane.f32.xlu1 %v1475_v16  ;;  %v3076_v16 = vld [vmem:[%s4533_s0 + $0x8] sm:$0xff]  }
 0x3e2   : > { %v3090_v17 = vpop.eup %3089 }
 0x3e3   : > { %v1478_v18 = vsel %vm1462_vm6, %v3090_v17, 0.0 }
 0x3e4   : > { %1479 = vadd.xlane.f32.xlu1 %v1478_v18 }
 0x3f5   : > { %1584 = vrot.lane.b32.xlu1 %v1351_v36, %s3559_s30 }
 0x3f9   : > { %1636 = vrot.lane.b32.xlu1 %v1352_v45, %s3559_s30 }
 0x46d   : > { %v1477_v20 = vpop.xlane.xlu1 %1476 }
 0x46e   : > { %3091 = vrcp.f32 %v1477_v20 }
 0x471   : > { %v1480_v21 = vpop.xlane.xlu1 %1479 }
 0x472   : > { %3093 = vrcp.f32 %v1480_v21 }
 0x475   : > { %v1585_v31 = vpop.permute.xlu1 %1584 }
 0x478   : > { %v3092_v22 = vpop.eup %3091 }
 0x479   : > { %v1483_v23 = vmul.f32 %v3092_v22, %v3088_v15  ;;  %v1637_v32 = vpop.permute.xlu1 %1636 }
 0x47b   : > { %v1485_v25 = vpack.c.bf16 %v1483_v23, %v1483_v23 }
 0x47c   : > { %v3094_v26 = vpop.eup %3093 }
 0x47d   : > { %v1484_v28 = vmul.f32 %v3094_v26, %v3090_v17  ;;  %2846 = vmatmul.mubr.msk.bf16.vlgmr.msra.gmra.mrb[8].mxu1 %vm1462_vm6, %v1485_v25 }
 0x47e   : > { %2856 = vmatpush3.bf16.xpose.msra.mxu1 %v1593_v27  ;;  %2857 = vmatprep.mubr.msk.bf16.mxu1 %vm3558_vm2, %v3557_v7 }
 0x47f   : > { %v1486_v29 = vpack.c.bf16 %v1484_v28, %v1484_v28  ;;  %2867 = vmatprep.subr.bf16.mxu1 %v3557_v7 }
 0x481   : > { %2852 = vmatmul.mubr.msk.bf16.vlgmr.msra.gmra.mrb[12].mxu0 %vm1462_vm6, %v1486_v29 }
 0x482   : > { %2862 = vmatpush3.bf16.xpose.msra.mxu0 %v1645_v30  ;;  %2863 = vmatprep.mubr.msk.bf16.mxu0 %vm3558_vm2, %v3557_v7 }
 0x483   : > { %2873 = vmatprep.subr.bf16.mxu0 %v3557_v7 }
 0x485   : > { %2858 = vmatmul.mubr.msk.bf16.vlgmr.msra.gmra.mrb[12].mxu1 %vm1369_vm4, %v1585_v31  ;;  %v2726_v31 = vld [vmem:[%s4534_s19] ss:$0 sm:$0xff] }
 0x486   : > { %2869 = vmatprep.mubr.msk.bf16.mxu1 %vm3558_vm2, %v3557_v7 }
 0x489   : > { %2864 = vmatmul.mubr.msk.bf16.vlgmr.msra.gmra.mrb[16].mxu0 %vm1369_vm4, %v1637_v32 }
 0x48a   : > { %2875 = vmatprep.mubr.msk.bf16.mxu0 %vm3558_vm2, %v3557_v7 }
 0x550   : > { %v4264_v33 = vpop.f32.mrb[8].mxu1 }
 0x551   : > { %v2847_v34 = vpop.f32.mrb[9].mxu1 }
 0x552   : > { %v1531_v35 = vpop.f32.mrb[10].mxu1 }
 0x553   : > { %v2848_v36 = vpop.f32.mrb[11].mxu1 }
 0x554   : > { %v1574_v37 = vpop.f32.mrb[12].mxu0 }
 0x555   : > { %v1580_v38 = vpack.c.bf16 %v1574_v37, %v4264_v33  ;;  %v2853_v39 = vpop.f32.mrb[13].mxu0 }
 0x556   : > { %v1577_v40 = vpop.f32.mrb[14].mxu0 }
 0x557   : > { %v2854_v41 = vpop.f32.mrb[15].mxu0 }
 0x558   : > { %v1629_v43 = vpop.f32.mrb[12].mxu1 }
 0x559   : > { %v1630_v44 = vadd.f32 %v1629_v43, %v4235_v56  ;;  %v2859_v45 = vpop.f32.mrb[13].mxu1 }
 0x55a   : > { %v1632_v46 = vpop.f32.mrb[14].mxu1 }
 0x55b   : > { %v2860_v48 = vpop.f32.mrb[15].mxu1  ;;  %v1687_v49 = vsel %vm1462_vm6, %v1630_v44, -inf }
 0x55c   : > { %1688 = vmax.xlane.f32.xlu0 %v1687_v49  ;;  %v1681_v50 = vpop.f32.mrb[16].mxu0 }
 0x55d   : > { %v1682_v51 = vadd.f32 %v1681_v50, %v4237_v57  ;;  %v2865_v52 = vpop.f32.mrb[17].mxu0 }
 0x55e   : > { %v1684_v53 = vpop.f32.mrb[18].mxu0 }
 0x55f   : > { %v2866_v54 = vpop.f32.mrb[19].mxu0  ;;  %v1690_v55 = vsel %vm1462_vm6, %v1682_v51, -inf }
 0x560   : > { %1691 = vmax.xlane.f32.xlu1 %v1690_v55  ;;  %v1146_v54 = vld [vmem:[%s4535_s1 + $0x8] sm:$0xff]  ;;  %v1145_v55 = vld [vmem:[%s4536_s8] sm:$0xff] }
 0x571   : > { %1761 = vrot.lane.b32.xlu1 %v4218_v47, %s3559_s30 }
 0x5e9   : > { %v1689_v58 = vpop.xlane.xlu0 %1688 }
 0x5ea   : > { %v1693_v56 = vsub.f32 %v1630_v44, %v1689_v58  ;;  %v3560_v44 = vmov 0   ;;  %v1148_v58 = vsub.f32 1.0, %v1146_v54 }
 0x5eb   : > { %3067 = vset.pattern.permute.xlu0 %v3560_v44  ;;  %3068 = vset.pattern.permute.xlu1 %v3560_v44 }
 0x5ec   : > { %v1695_v59 = vmul.f32 1.442695, %v1693_v56  ;;  %v1147_v56 = vsub.f32 1.0, %v1145_v55 }
 0x5ed   : > { %v1692_v60 = vpop.xlane.xlu1 %1691 }
 0x5ee   : > { %3095 = vpow2.f32 %v1695_v59  ;;  %v1694_v61 = vsub.f32 %v1682_v51, %v1692_v60  ;;  %v3077_v59 = vld [vmem:[%s4141_s23] sm:$0xff]   ;;  %v3078_v60 = vld [vmem:[%s4141_s23 + $0x8] sm:$0xff]  }
 0x5f0   : > { %v1697_v62 = vmul.f32 1.442695, %v1694_v61  ;;  %v3083_v61 = vld [vmem:[%s4146_s13] sm:$0xff]  }
 0x5f1   : > { %v1762_v63 = vpop.permute.xlu1 %1761 }
 0x5f2   : > { %3097 = vpow2.f32 %v1697_v62  ;;  %v1767_v57 = vsel %vm1490_vm5, %v1762_v63, 0  ;;  %v3084_v62 = vld [vmem:[%s4146_s13 + $0x8] sm:$0xff]  }
 0x5f3   : > { %2874 = vmatpush3.bf16.msra.mxu0 %v1767_v57 }
 0x5f4   : > { %2885 = vmatprep.subr.bf16.mxu0 %v3557_v7 }
 0x5f8   : > { %v3096_v0 = vpop.eup %3095 }
 0x5f9   : > { %v1699_v1 = vsel %vm1462_vm6, %v3096_v0, 0.0 }
 0x5fa   : > { %1700 = vadd.xlane.f32.xlu0 %v1699_v1 }
 0x5fc   : > { %v3098_v2 = vpop.eup %3097 }
 0x5fd   : > { %v1702_v47 = vsel %vm1462_vm6, %v3098_v2, 0.0 }
 0x5fe   : > { %1703 = vadd.xlane.f32.xlu0 %v1702_v47 }
 0x614   : > { %1712 = vrot.lane.b32.xlu0 %v4213_v42, %s3559_s30  ;;  %v3075_v42 = vld [vmem:[%s4532_s6] sm:$0xff]  }
 0x687   : > { %v1701_v3 = vpop.xlane.xlu0 %1700 }
 0x688   : > { %3099 = vrcp.f32 %v1701_v3 }
 0x68b   : > { %v1704_v4 = vpop.xlane.xlu0 %1703 }
 0x68c   : > { %3101 = vrcp.f32 %v1704_v4  ;;  %v2727_v4 = vld [vmem:[%s4537_s3] ss:$0 sm:$0xff] }
 0x68f   : > { %v1713_v5 = vpop.permute.xlu0 %1712 }
 0x690   : > { %v1718_v6 = vsel %vm1490_vm5, %v1713_v5, 0 }
 0x691   : > { %2868 = vmatpush3.bf16.msra.mxu1 %v1718_v6 }
 0x692   : > { %v3100_v8 = vpop.eup %3099  ;;  %2879 = vmatprep.subr.bf16.mxu1 %v3557_v7 }
 0x693   : > { %v1707_v9 = vmul.f32 %v3100_v8, %v3096_v0  ;;  %v2728_v8 = vld [vmem:[%s4538_s9] ss:$0 sm:$0xff] }
 0x695   : > { %v1709_v12 = vpack.c.bf16 %v1707_v9, %v1707_v9 }
 0x696   : > { %v3102_v13 = vpop.eup %3101 }
 0x697   : > { %v1708_v14 = vmul.f32 %v3102_v13, %v3098_v2  ;;  %2870 = vmatmul.mubr.msk.bf16.vlgmr.msra.gmra.mrb[16].mxu1 %vm1462_vm6, %v1709_v12 }
 0x698   : > { %2881 = vmatprep.mubr.msk.bf16.mxu1 %vm3558_vm2, %v3557_v7  ;;  %2880 = vmatpush3.bf16.msra.mxu1 %v3076_v16 }
 0x699   : > { %v1710_v15 = vpack.c.bf16 %v1708_v14, %v1708_v14  ;;  %2891 = vmatprep.subr.bf16.mxu1 %v3557_v7 }
 0x69b   : > { %2876 = vmatmul.mubr.msk.bf16.vlgmr.msra.gmra.mrb[20].mxu0 %vm1462_vm6, %v1710_v15 }
 0x69c   : > { %2886 = vmatpush3.bf16.msra.mxu0 %v3075_v42  ;;  %2887 = vmatprep.mubr.msk.bf16.mxu0 %vm3558_vm2, %v3557_v7 }
 0x69d   : > { %2915 = vmatprep.subr.bf16.mxu0 %v3557_v7 }
 0x6a3   : > { %2888 = vmatmul.mubr.msk.bf16.vlgmr.msra.gmra.mrb[24].mxu0 %vm1369_vm4, %v1580_v38 }
 0x6a4   : > { %2923 = vmatprep.mubr.msk.bf16.mxu0 %vm3558_vm2, %v3557_v7  ;;  %2916 = vmatpush3.bf16.msra.mxu0 %v3083_v61 }
 0x6a5   : > { %2917 = vmatprep.subr.bf16.mxu0 %v3557_v7 }
 0x6a8   : > { %2918 = vmatpush3.bf16.msra.mxu0 %v3084_v62 }
 0x6a9   : > { %2919 = vmatprep.subr.bf16.mxu0 %v3557_v7 }
 0x76a   : > { %v1754_v17 = vpop.f32.mrb[16].mxu1 }
 0x76b   : > { %v2871_v18 = vpop.f32.mrb[17].mxu1 }
 0x76c   : > { %v1757_v19 = vpop.f32.mrb[18].mxu1 }
 0x76d   : > { %v2872_v20 = vpop.f32.mrb[19].mxu1 }
 0x76e   : > { %v1803_v21 = vpop.f32.mrb[20].mxu0 }
 0x76f   : > { %v1809_v22 = vpack.c.bf16 %v1803_v21, %v1754_v17  ;;  %v2877_v23 = vpop.f32.mrb[21].mxu0  ;;  %v3079_v21 = vld [vmem:[%s4141_s23 + $0x10] sm:$0xff]  }
 0x770   : > { %v1806_v24 = vpop.f32.mrb[22].mxu0  ;;  %v3080_v23 = vld [vmem:[%s4141_s23 + $0x18] sm:$0xff]  }
 0x771   : > { %v2878_v25 = vpop.f32.mrb[23].mxu0  ;;  %2882 = vmatmul.mubr.msk.bf16.vlgmr.msra.gmra.mrb[20].mxu1 %vm1369_vm4, %v1809_v22 }
 0x772   : > { %2895 = vmatprep.mubr.msk.bf16.mxu1 %vm3558_vm2, %v3557_v7  ;;  %2892 = vmatpush3.bf16.msra.mxu1 %v3077_v59 }
 0x773   : > { %2893 = vmatprep.subr.bf16.mxu1 %v3557_v7 }
 0x776   : > { %v1905_v26 = vpop.f32.mrb[24].mxu0  ;;  %2894 = vmatpush3.bf16.msra.mxu1 %v3078_v60 }
 0x777   : > { %v2889_v27 = vpop.f32.mrb[25].mxu0  ;;  %2899 = vmatprep.subr.bf16.mxu1 %v3557_v7 }
 0x778   : > { %v1908_v28 = vpop.f32.mrb[26].mxu0 }
 0x779   : > { %v2890_v29 = vpop.f32.mrb[27].mxu0 }
 0x844   : > { %v1855_v30 = vpop.f32.mrb[20].mxu1 }
 0x845   : > { %v1906_v32 = vadd.f32 %v1905_v26, %v1855_v30  ;;  %v2883_v33 = vpop.f32.mrb[21].mxu1  ;;  %v3081_v26 = vld [vmem:[%s4141_s23 + $0x20] sm:$0xff]  }
 0x846   : > { %v1858_v34 = vpop.f32.mrb[22].mxu1  ;;  %v3086_v33 = vld [vmem:[%s4146_s13 + $0x18] sm:$0xff]  }
 0x847   : > { %v1919_v35 = vadd.f32 %v2726_v31, %v1906_v32  ;;  %v1909_v36 = vadd.f32 %v1908_v28, %v1858_v34  ;;  %v2884_v37 = vpop.f32.mrb[23].mxu1  ;;  %v3082_v28 = vld [vmem:[%s4141_s23 + $0x28] sm:$0xff]   ;;  %v3085_v32 = vld [vmem:[%s4146_s13 + $0x10] sm:$0xff]   ;;  %v2729_v34 = vld [vmem:[%s964_s24] ss:$0 sm:$0xff] }
 0x848   : > { %2920 = vmatpush3.bf16.msra.mxu0 %v3085_v32 }
 0x849   : > { %v1920_v38 = vadd.f32 %v2726_v31, %v1909_v36  ;;  %v1921_v39 = vadd.f32 %v1919_v35, %v4175_v10  ;;  %2921 = vmatprep.subr.bf16.mxu0 %v3557_v7 }
 0x84b   : > { %v1925_v40 = vsel %vm1176_vm3, %v1921_v39, 0.0  ;;  %v1922_v41 = vadd.f32 %v1920_v38, %v4177_v11 }
 0x84c   : > { %1926 = vadd.xlane.f32.xlu1 %v1925_v40  ;;  %2922 = vmatpush3.bf16.msra.mxu0 %v3086_v33 }
 0x84d   : > { %v1928_v43 = vsel %vm1176_vm3, %v1922_v41, 0.0 }
 0x84e   : > { %1929 = vadd.xlane.f32.xlu0 %v1928_v43 }
 0x8d9   : > { %v1927_v45 = vpop.xlane.xlu1 %1926 }
 0x8da   : > { %v1932_v46 = vmul.f32 0.03125, %v1927_v45 }
 0x8db   : > { %v1930_v48 = vpop.xlane.xlu0 %1929 }
 0x8dc   : > { %v1934_v49 = vsub.f32 %v1921_v39, %v1932_v46  ;;  %v1933_v50 = vmul.f32 0.03125, %v1930_v48 }
 0x8de   : > { %v1935_v51 = vsub.f32 %v1922_v41, %v1933_v50  ;;  %v1936_v10 = vmul.f32 %v1934_v49, %v1934_v49 }
 0x8e0   : > { %v1938_v52 = vsel %vm1176_vm3, %v1936_v10, 0.0  ;;  %v1937_v53 = vmul.f32 %v1935_v51, %v1935_v51 }
 0x8e1   : > { %1939 = vadd.xlane.f32.xlu0 %v1938_v52 }
 0x8e2   : > { %v1941_v11 = vsel %vm1176_vm3, %v1937_v53, 0.0 }
 0x8e3   : > { %1942 = vadd.xlane.f32.xlu1 %v1941_v11 }
 0x8f4   : > { %1975 = vperm.xlu1 %3068, %v1148_v58  }
 0x8f7   : > { %1970 = vperm.xlu0 %3067, %v1147_v56  }
 0x96e   : > { %v1940_v63 = vpop.xlane.xlu0 %1939 }
 0x96f   : > { %v1944_v57 = vmul.f32 0.03125, %v1940_v63 }
 0x970   : > { %v1943_v0 = vpop.xlane.xlu1 %1942 }
 0x971   : > { %v1946_v1 = vadd.f32 1e-05, %v1944_v57  ;;  %v1945_v2 = vmul.f32 0.03125, %v1943_v0 }
 0x973   : > { %3103 = vrsqrt.f32 %v1946_v1  ;;  %v1947_v47 = vadd.f32 1e-05, %v1945_v2 }
 0x974   : > { %v4327_v15 = vpop.permute.xlu1 %1975 }
 0x975   : > { %3105 = vrsqrt.f32 %v1947_v47 }
 0x976   : > { %v4325_v13 = vpop.permute.xlu0 %1970 }
 0x97d   : > { %v3104_v3 = vpop.eup %3103 }
 0x97e   : > { %v1950_v5 = vmul.f32 %v3104_v3, %v1934_v49 }
 0x97f   : > { %v3106_v6 = vpop.eup %3105 }
 0x980   : > { %v1958_v9 = vmul.f32 %v2727_v4, %v1950_v5  ;;  %v1951_v12 = vmul.f32 %v3106_v6, %v1935_v51  ;;  %v2753_v6 = vld [vmem:[%s1119_s25] ss:$0 sm:$0xff] }
 0x982   : > { %v1966_v14 = vadd.f32 %v2728_v8, %v1958_v9  ;;  %v1959_v42 = vmul.f32 %v2727_v4, %v1951_v12  ;;  %v2754_v9 = vld [vmem:[%s1122_s11] ss:$0 sm:$0xff]  ;;  %s3439_s11 = scalar_lea.vmem %s2331_s17, 256 }
 0x983   : > { %p3440_p1 = scmp.ne.s32.totalorder %s2331_s17, %s3439_s11  ;;  %p3447_p13 = scmp.lt.s32.totalorder %s3439_s11, %s3439_s11 }
 0x984   : > { %v1978_v16 = vmul.f32 %v4325_v13, %v1966_v14  ;;  %v1967_v17 = vadd.f32 %v2728_v8, %v1959_v42 }
 0x985   : > { %p3441_p9 = pnand %p3440_p1, %p3004_p2  ;;  %p3448_p10 = por %p3447_p13, %p3446_p0 }
 0x986   : > { %1981 = vst.msk [vmem:[#allocation2 + $0x1] sm:$0xff] %vm1176_vm3, %v1978_v16  ;;  %v1979_v18 = vmul.f32 %v4327_v15, %v1967_v17 }
 0x987   : > { %p3442_p8 = pneg %p3441_p9 }
 0x988   : > { %1982 = vst.msk [vmem:[#allocation2 + $0x11] sm:$0xff] %vm1176_vm3, %v1979_v18 }
 0x989   : > { %p3449_p11 = pnand %p3448_p10, %p3442_p8 }
 0x98d   : > { %v1983_v19 = vld [vmem:[#allocation2] sm:$0xff] }
 0x98e   : > { %v2052_v25 = vld [vmem:[#allocation2 + $0x1] sm:$0xff] }
 0x98f   : > { %v1984_v20 = vld [vmem:[#allocation2 + $0x10] sm:$0xff]  ;;  %v2118_v30 = vld [vmem:[#allocation2 + $0x2] sm:$0xff] }
 0x990   : > { %v1985_v22 = vpack.c.bf16 %v1984_v20, %v1983_v19  ;;  %v2053_v24 = vld [vmem:[#allocation2 + $0x11] sm:$0xff] }
 0x991   : > { %v2054_v27 = vpack.c.bf16 %v2053_v24, %v2052_v25  ;;  %v2119_v29 = vld [vmem:[#allocation2 + $0x12] sm:$0xff] }
 0x992   : > { %2896 = vmatmul.mubr.msk.bf16.vlgmr.msra.gmra.mrb[24].mxu1 %vm1176_vm3, %v1985_v22  ;;  %v2120_v31 = vpack.c.bf16 %v2119_v29, %v2118_v30 }
 0x993   : > { %2900 = vmatpush3.bf16.msra.mxu1 %v3079_v21  ;;  %2903 = vmatprep.mubr.msk.bf16.mxu1 %vm3558_vm2, %v3557_v7 }
 0x994   : > { %2901 = vmatprep.subr.bf16.mxu1 %v3557_v7 }
 0x997   : > { %2902 = vmatpush3.bf16.msra.mxu1 %v3080_v23 }
 0x998   : > { %2907 = vmatprep.subr.bf16.mxu1 %v3557_v7 }
 0x99e   : > { %2904 = vmatmul.mubr.msk.bf16.vlgmr.msra.gmra.mrb[24].mxu1 %vm1176_vm3, %v2054_v27 }
 0x99f   : > { %2908 = vmatpush3.bf16.msra.mxu1 %v3081_v26  ;;  %2911 = vmatprep.mubr.msk.bf16.mxu1 %vm3558_vm2, %v3557_v7 }
 0x9a0   : > { %2909 = vmatprep.subr.bf16.mxu1 %v3557_v7  ;;  %v2747_v7 = vld [vmem:[%s1116_s7] ss:$0 sm:$0xff] }
 0x9a3   : > { %2910 = vmatpush3.bf16.msra.mxu1 %v3082_v28 }
 0x9aa   : > { %2912 = vmatmul.mubr.msk.bf16.vlgmr.msra.gmra.mrb[24].mxu1 %vm1176_vm3, %v2120_v31 }
 0xa7d   : > { %v2175_v35 = vpop.f32.mrb[24].mxu1 }
 0xa7e   : > { %v2927_v36 = vadd.f32 %v2729_v34, %v2175_v35  ;;  %v2913_v37 = vpop.f32.mrb[25].mxu1 }
 0xa7f   : > { %v2178_v38 = vpop.f32.mrb[26].mxu1 }
 0xa80   : > { %v2928_v39 = vadd.f32 %v2729_v34, %v2178_v38  ;;  %v2914_v40 = vpop.f32.mrb[27].mxu1  ;;  %v2184_v41 = vmax.f32 %v2927_v36, 0.0 }
 0xa82   : > { %v2185_v43 = vmax.f32 %v2928_v39, 0.0 }
 0xa84   : > { %v2187_v44 = vpack.c.bf16 %v2185_v43, %v2184_v41 }
 0xa86   : > { %2924 = vmatmul.mubr.msk.bf16.vlgmr.msra.gmra.mrb[28].mxu0 %vm2226_vm7, %v2187_v44 }
 0xb59   : > { %v2264_v45 = vpop.f32.mrb[28].mxu0 }
 0xb5a   : > { %v2265_v46 = vadd.f32 %v2747_v7, %v2264_v45  ;;  %v2925_v48 = vpop.f32.mrb[29].mxu0 }
 0xb5b   : > { %v2267_v49 = vpop.f32.mrb[30].mxu0 }
 0xb5c   : > { %v2268_v50 = vadd.f32 %v2747_v7, %v2267_v49  ;;  %v2926_v51 = vpop.f32.mrb[31].mxu0  ;;  %v2271_v10 = vadd.f32 %v2265_v46, %v1978_v16 }
 0xb5e   : > { %v2275_v52 = vsel %vm1176_vm3, %v2271_v10, 0.0  ;;  %v2272_v53 = vadd.f32 %v2268_v50, %v1979_v18 }
 0xb5f   : > { %2276 = vadd.xlane.f32.xlu1 %v2275_v52 }
 0xb60   : > { %v2278_v11 = vsel %vm1176_vm3, %v2272_v53, 0.0 }
 0xb61   : > { %2279 = vadd.xlane.f32.xlu0 %v2278_v11 }
 0xbec   : > { %v2277_v54 = vpop.xlane.xlu1 %2276 }
 0xbed   : > { %v2281_v55 = vmul.f32 0.03125, %v2277_v54 }
 0xbee   : > { %v2280_v58 = vpop.xlane.xlu0 %2279 }
 0xbef   : > { %v2283_v56 = vsub.f32 %v2271_v10, %v2281_v55  ;;  %v2282_v59 = vmul.f32 0.03125, %v2280_v58 }
 0xbf1   : > { %v2284_v60 = vsub.f32 %v2272_v53, %v2282_v59  ;;  %v2285_v61 = vmul.f32 %v2283_v56, %v2283_v56 }
 0xbf3   : > { %v2287_v62 = vsel %vm1176_vm3, %v2285_v61, 0.0  ;;  %v2286_v63 = vmul.f32 %v2284_v60, %v2284_v60 }
 0xbf4   : > { %2288 = vadd.xlane.f32.xlu1 %v2287_v62 }
 0xbf5   : > { %v2290_v57 = vsel %vm1176_vm3, %v2286_v63, 0.0 }
 0xbf8   : > { %2291 = vadd.xlane.f32.xlu1 %v2290_v57 }
 0xc81   : > { %v2289_v0 = vpop.xlane.xlu1 %2288 }
 0xc82   : > { %v2293_v1 = vmul.f32 0.03125, %v2289_v0 }
 0xc84   : > { %v2295_v2 = vadd.f32 1e-05, %v2293_v1 }
 0xc85   : > { %v2292_v47 = vpop.xlane.xlu1 %2291 }
 0xc86   : > { %3107 = vrsqrt.f32 %v2295_v2  ;;  %v2294_v3 = vmul.f32 0.03125, %v2292_v47 }
 0xc88   : > { %v2296_v4 = vadd.f32 1e-05, %v2294_v3 }
 0xc8a   : > { %3109 = vrsqrt.f32 %v2296_v4 }
 0xc90   : > { %v3108_v5 = vpop.eup %3107 }
 0xc91   : > { %v2299_v8 = vmul.f32 %v3108_v5, %v2283_v56 }
 0xc93   : > { %v2307_v12 = vmul.f32 %v2753_v6, %v2299_v8 }
 0xc94   : > { %v3110_v14 = vpop.eup %3109 }
 0xc95   : > { %v2300_v42 = vmul.f32 %v3110_v14, %v2284_v60  ;;  %v2315_v16 = vadd.f32 %v2754_v9, %v2307_v12 }
 0xc97   : > { %v2308_v17 = vmul.f32 %v2753_v6, %v2300_v42  ;;  %v2317_v18 = vmul.f32 %v2315_v16, %v4325_v13 }
 0xc99   : > { %v2316_v19 = vadd.f32 %v2754_v9, %v2308_v17  ;;  %2319 = vst.msk [vmem:[#allocation21] sm:$0xff] %vm1176_vm3, %v2317_v18 }
 0xc9b   : > { %v2318_v20 = vmul.f32 %v2316_v19, %v4327_v15 }
 0xc9d   : > { %2320 = vst.msk [vmem:[#allocation21 + $0x8] sm:$0xff] %vm1176_vm3, %v2318_v20 }
 0xc9e   : > { %3452 = shalt.err (!%p3449_p11)
}
 0xc9f   : > { %s4542_s14 = sld [smem:[#allocation53_spill]] }
 0xca5   : > { %s3453_s6 = scalar_lea.hbm %s4542_s14, 256 }
 0xca6   : > { %p3454_p4 = scmp.ne.s32.totalorder %s4542_s14, %s3453_s6  ;;  %p3459_p12 = scmp.lt.u32.totalorder %s3453_s6, %s4542_s14 }
 0xca8   : > { %p3455_p5 = pnand %p3454_p4, %p3004_p2 }
 0xcaa   : > { %p3456_p7 = pneg %p3455_p5 }
 0xcac   : > { %p3461_p3 = pnand %p3459_p12, %p3456_p7 }
 0xcae   : > { %3464 = shalt.err (!%p3461_p3)
}
 0xcaf   : > { %s3562_s1 = smov 128   ;;  %s3563_s10 = smov 8  }
 0xcb0   : > { %2963 = dma.vmem_to_hbm [thread:$0]  (%p3004_p2), %s2331_s17, 256, %s4542_s14, [#allocation5], %s3562_s1, %s3562_s1, %s3563_s10  }
 0xcb1   : > { %3514 = dma.done.wait (%p3004_p2), [#allocation5], 256  }
 0xcb2   : > { %3516 = vsyncadd (%p3004_p2), [#allocation5], 4294967040 }
 0xcb3 PF: > { %s4543_s9 = sld [smem:[#allocation32_spill]]  ;;  %s4544_s23 = sld [smem:[#allocation29_spill]] }
 0xcb4   : > { %s4545_s16 = sld [smem:[#allocation34_spill]]  ;;  %s4546_s24 = sld [smem:[#allocation31_spill]] }
 0xcb5   : > { %s4547_s2 = sld [smem:[#allocation33_spill]]  ;;  %s4548_s1 = smov %s3523_s22 }
 0xcb9   : > { %s47_s25 = sadd.s32 1, %s4543_s9   ;;  %s4549_s22 = smov %s4544_s23 }
 0xcba   : > { %p44_p6 = scmp.ge.s32.totalorder %s47_s25, 4   ;;  %s4550_s23 = smov %s4545_s16 }
 0xcbc   :  { %46 = sbr.rel (!%p44_p6) target bundleno = 34 (0x22), region = 281 }
 0xcc3   :  { %2346 = vsyncpa [#allocation4], 1 }
 0xcc4   :  { %2348 = vsyncpa [#allocation4 + $0x1], 1 }
 0xcc5   :  { %2349 = vsyncpa [#allocation7], 1 }
 0xcc6   :  { %2351 = vsyncpa [#allocation7 + $0x1], 1 }
 0xcc7   :  { %2352 = vsyncpa [#allocation10], 1 }
 0xcc8   :  { %2354 = vsyncpa [#allocation10 + $0x1], 1 }
 0xcc9   :  { %2355 = vsyncpa [#allocation13], 1 }
 0xcca   :  { %2357 = vsyncpa [#allocation13 + $0x1], 1 }
 0xccb   :  { %2358 = vsyncpa [#allocation16], 1 }
 0xccc   :  { %2360 = vsyncpa [#allocation16 + $0x1], 1 }
 0xccd   :  { %2361 = vsyncpa [#allocation19], 1 }
 0xcce   :  { %2363 = vsyncpa [#allocation19 + $0x1], 1 }
 0xccf   :  { %2364 = vsyncpa [#allocation5], 1 }
 0xcd0   :  { %2366 = vsyncpa [#allocation5 + $0x1], 1 }

</bundles_post_ra>
